<compile_context>
chip_gen: v6e
topology: v6e:2x2x1
jax: 0.10.0
libtpu: 0.0.40
codegen_flags: <defaults>
</compile_context>

<pallas_src>
import functools

import jax
import jax.numpy as jnp
from jax import lax
from jax.experimental import pallas as pl
from jax.experimental.pallas import tpu as pltpu


def _cosine_kernel(idx1_ref, idx2_ref, t1_ref, t2_ref, o_ref, e1_acc, e2_acc,
                   *, block_b, tile_n):
    """Grid = (batch blocks, table tiles).  One step: gather partial rows via
    one-hot MXU matmuls; on the last table tile compute cosine + log-sigmoid.

    idx1_ref/idx2_ref : (block_b, 1) int32 VMEM blocks
    t1_ref/t2_ref     : (tile_n, dim) table tiles (VMEM, pipelined)
    o_ref             : (1, block_b) float32 lane-dense output block
    e1_acc/e2_acc     : (block_b, dim) float32 VMEM accumulators
    """
    n = pl.program_id(1)

    @pl.when(n == 0)
    def _():
        e1_acc[...] = jnp.zeros_like(e1_acc)
        e2_acc[...] = jnp.zeros_like(e2_acc)

    base = n * tile_n
    idx1 = idx1_ref[...] - base            # (block_b, 1), local to this tile
    idx2 = idx2_ref[...] - base
    cols = lax.broadcasted_iota(jnp.int32, (block_b, tile_n), 1)

    oh1 = (cols == idx1).astype(t1_ref.dtype)      # (block_b, tile_n)
    oh2 = (cols == idx2).astype(t2_ref.dtype)

    # One-hot gather on the MXU; accumulate in f32.
    e1_acc[...] += jnp.dot(oh1, t1_ref[...], preferred_element_type=jnp.float32)
    e2_acc[...] += jnp.dot(oh2, t2_ref[...], preferred_element_type=jnp.float32)

    @pl.when(n == pl.num_programs(1) - 1)
    def _():
        e1 = e1_acc[...]                           # (block_b, dim) f32
        e2 = e2_acc[...]

        dot = jnp.sum(e1 * e2, axis=-1)            # (block_b,)
        n1sq = jnp.sum(e1 * e1, axis=-1)
        n2sq = jnp.sum(e2 * e2, axis=-1)

        eps_sq = jnp.float32(1e-6 * 1e-6)
        # 1 / max(||e||, eps) == rsqrt(max(||e||^2, eps^2))  -> EUP
        inv1 = lax.rsqrt(jnp.maximum(n1sq, eps_sq))
        inv2 = lax.rsqrt(jnp.maximum(n2sq, eps_sq))

        z = jnp.float32(100.0) * dot * inv1 * inv2
        # stable log(sigmoid(z)) = min(z, 0) - log(1 + exp(-|z|))
        logsig = jnp.minimum(z, jnp.float32(0.0)) - jnp.log(
            jnp.float32(1.0) + jnp.exp(-jnp.abs(z)))

        o_ref[...] = logsig.reshape(1, block_b)


def _round_up(x, m):
    return ((x + m - 1) // m) * m


def _vmem_capacity_bytes():
    try:
        return int(pltpu.get_tpu_info().vmem_capacity_bytes)
    except Exception:
        return 64 * 1024 * 1024    # conservative: v7x per-TensorCore VMEM


def cosine_forward(idx1, idx2, emb1_unused, emb2_unused, table1, table2, *,
                   block_b=1024, tile_n_max=1024):
    """Pallas implementation of Cosine.forward.

    idx1, idx2: int (B,);  table1, table2: (N, dim) embedding tables.
    Returns float32 (B,).
    """
    del emb1_unused, emb2_unused     # the PyTorch forward overwrites them too
    B = idx1.shape[0]
    N, dim = table1.shape
    itemsize = max(jnp.dtype(table1.dtype).itemsize,
                   jnp.dtype(table2.dtype).itemsize)

    capacity = _vmem_capacity_bytes()

    # ---- batch blocking ------------------------------------------------------
    block_b = max(128, min(block_b, _round_up(B, 128)))
    # keep the two f32 (block_b, dim) accumulators modest for very large `dim`
    while block_b > 128 and 2 * block_b * dim * 4 > capacity // 8:
        block_b = max(128, _round_up(block_b // 2, 128))
    num_b = pl.cdiv(B, block_b)
    b_pad = num_b * block_b

    idx1 = jnp.clip(idx1.astype(jnp.int32), 0, N - 1)
    idx2 = jnp.clip(idx2.astype(jnp.int32), 0, N - 1)
    if b_pad != B:
        pad = jnp.zeros((b_pad - B,), jnp.int32)   # row 0 is always valid
        idx1 = jnp.concatenate([idx1, pad])
        idx2 = jnp.concatenate([idx2, pad])
    idx1 = idx1.reshape(b_pad, 1)
    idx2 = idx2.reshape(b_pad, 1)

    # ---- table tiling along N (streams tables that do not fit VMEM) ---------
    headroom = 16 * 1024 * 1024
    scratch_bytes = 2 * block_b * dim * 4                 # f32 accumulators
    idx_bytes = 2 * 2 * block_b * 128 * 4                 # pessimistic lane pad
    out_bytes = 2 * 8 * block_b * 4
    fixed = scratch_bytes + idx_bytes + out_bytes + headroom
    # per unit of tile_n: 2 tables x 2 pipeline buffers + 2 one-hot transients
    per_n = 4 * dim * itemsize + 2 * block_b * 4
    budget = max(capacity - fixed, 8 * per_n)
    tile_n = min(_round_up(N, 8), tile_n_max, max(8, (budget // per_n) // 8 * 8))
    # TODO(synk): for very large N a double-buffered HBM row-gather
    # (pl.ANY tables + pltpu.make_async_copy per row) avoids streaming the
    # whole table for every batch block; the one-hot streaming path here is
    # always correct but not traffic-optimal in that regime.

    num_n = pl.cdiv(N, tile_n)
    n_pad = num_n * tile_n
    if n_pad != N:
        table1 = jnp.pad(table1, ((0, n_pad - N), (0, 0)))
        table2 = jnp.pad(table2, ((0, n_pad - N), (0, 0)))

    need = (scratch_bytes + idx_bytes + out_bytes
            + 4 * tile_n * dim * itemsize          # table tiles, double-buffered
            + 2 * block_b * tile_n * 4             # one-hot transients (f32 worst)
            + headroom)
    vmem_limit = int(min(capacity, max(need, 32 * 1024 * 1024)))

    kernel = functools.partial(_cosine_kernel, block_b=block_b, tile_n=tile_n)

    grid_spec = pltpu.PrefetchScalarGridSpec(
        num_scalar_prefetch=0,
        grid=(num_b, num_n),
        in_specs=[
            pl.BlockSpec((block_b, 1), lambda b, n: (b, 0)),
            pl.BlockSpec((block_b, 1), lambda b, n: (b, 0)),
            pl.BlockSpec((tile_n, dim), lambda b, n: (n, 0)),
            pl.BlockSpec((tile_n, dim), lambda b, n: (n, 0)),
        ],
        out_specs=pl.BlockSpec((1, block_b), lambda b, n: (0, b)),
        scratch_shapes=[
            pltpu.VMEM((block_b, dim), jnp.float32),
            pltpu.VMEM((block_b, dim), jnp.float32),
        ],
    )

    out = pl.pallas_call(
        kernel,
        out_shape=jax.ShapeDtypeStruct((1, b_pad), jnp.float32),
        grid_spec=grid_spec,
        compiler_params=pltpu.CompilerParams(
            dimension_semantics=("parallel", "arbitrary"),
            vmem_limit_bytes=vmem_limit,
        ),
    )(idx1, idx2, table1, table2)

    return out.reshape(b_pad)[:B]


def cosine_reference(idx1, idx2, table1, table2):
    e1 = table1[idx1]
    e2 = table2[idx2]
    eps = 1e-6
    dot = jnp.sum(e1 * e2, axis=-1)
    n1 = jnp.maximum(jnp.linalg.norm(e1, axis=-1), eps)
    n2 = jnp.maximum(jnp.linalg.norm(e2, axis=-1), eps)
    cos = dot / (n1 * n2)
    return jax.nn.log_sigmoid(100.0 * cos)


if __name__ == "__main__":
    key = jax.random.PRNGKey(0)

    # --- test 1: small shapes consistent with the module (single tile/block) -
    N, dim, B = 16, 32, 8
    k1, k2, k3, k4 = jax.random.split(key, 4)
    table1 = jax.random.normal(k1, (N, dim), dtype=jnp.float32)  # Embedding ~ N(0,1)
    table2 = jax.random.normal(k2, (N, dim), dtype=jnp.float32)
    idx1 = jax.random.randint(k3, (B,), 0, N, dtype=jnp.int32)
    idx2 = jax.random.randint(k4, (B,), 0, N, dtype=jnp.int32)
    dummy1 = jnp.zeros((B, dim), jnp.float32)   # ignored by the module's forward
    dummy2 = jnp.zeros((B, dim), jnp.float32)

    out = cosine_forward(idx1, idx2, dummy1, dummy2, table1, table2)
    out = jax.block_until_ready(out)
    ref = cosine_reference(idx1, idx2, table1, table2)
    assert out.shape == (B,)
    assert bool(jnp.all(jnp.isfinite(out))), out
    assert jnp.allclose(out, ref, atol=1e-4, rtol=1e-4), (out, ref)

    # --- test 2: exercises multi batch-block + multi table-tile accumulation -
    N2, dim2, B2 = 40, 32, 300
    k5, k6, k7, k8 = jax.random.split(jax.random.PRNGKey(1), 4)
    t1b = jax.random.normal(k5, (N2, dim2), dtype=jnp.float32)
    t2b = jax.random.normal(k6, (N2, dim2), dtype=jnp.float32)
    i1b = jax.random.randint(k7, (B2,), 0, N2, dtype=jnp.int32)
    i2b = jax.random.randint(k8, (B2,), 0, N2, dtype=jnp.int32)
    out2 = cosine_forward(i1b, i2b, None, None, t1b, t2b,
                          block_b=128, tile_n_max=16)
    out2 = jax.block_until_ready(out2)
    ref2 = cosine_reference(i1b, i2b, t1b, t2b)
    assert out2.shape == (B2,)
    assert bool(jnp.all(jnp.isfinite(out2))), out2
    assert jnp.allclose(out2, ref2, atol=1e-4, rtol=1e-4), (out2, ref2)

    print("KERNEL_OK")
</pallas_src>

<mosaic_0001>
module attributes {stable_mosaic.version = 11 : i64} {
  func.func @_cosine_kernel(%arg0: i32, %arg1: i32, %arg2: memref<128x1xi32, #tpu.memory_space<vmem>>, %arg3: memref<128x1xi32, #tpu.memory_space<vmem>>, %arg4: memref<16x32xf32, #tpu.memory_space<vmem>>, %arg5: memref<16x32xf32, #tpu.memory_space<vmem>>, %arg6: memref<1x128xf32, #tpu.memory_space<vmem>>, %arg7: memref<128x32xf32, #tpu.memory_space<vmem>>, %arg8: memref<128x32xf32, #tpu.memory_space<vmem>>) attributes {dimension_semantics = [#tpu.dimension_semantics<parallel>, #tpu.dimension_semantics<arbitrary>], iteration_bounds = array<i64: 1, 1>, scalar_prefetch = 0 : i64, scratch_operands = 2 : i64, tpu.core_type = #tpu.core_type<tc>, window_params = [{transform_indices = @transform_0, window_bounds = array<i64: 128, 1>}, {transform_indices = @transform_1, window_bounds = array<i64: 128, 1>}, {transform_indices = @transform_2, window_bounds = array<i64: 16, 32>}, {transform_indices = @transform_3, window_bounds = array<i64: 16, 32>}, {transform_indices = @transform_4, window_bounds = array<i64: 1, 128>}]} {
    %c0_i32 = arith.constant 0 : i32
    %0 = arith.cmpi eq, %arg1, %c0_i32 : i32
    %1 = arith.extui %0 : i1 to i32
    %c0_i32_0 = arith.constant 0 : i32
    %2 = arith.cmpi ne, %1, %c0_i32_0 : i32
    scf.if %2 {
      %cst_19 = arith.constant 0.000000e+00 : f32
      %32 = vector.broadcast %cst_19 : f32 to vector<128x32xf32>
      %c0_20 = arith.constant 0 : index
      %c0_21 = arith.constant 0 : index
      %33 = vector.load %arg7[%c0_20, %c0_21] : memref<128x32xf32, #tpu.memory_space<vmem>>, vector<128x32xf32>
      tpu.vector_store %arg7[%c0_20, %c0_21], %32 {strides = array<i32>} : memref<128x32xf32, #tpu.memory_space<vmem>>, vector<128x32xf32>,
      %cst_22 = arith.constant 0.000000e+00 : f32
      %34 = vector.broadcast %cst_22 : f32 to vector<128x32xf32>
      %c0_23 = arith.constant 0 : index
      %c0_24 = arith.constant 0 : index
      %35 = vector.load %arg8[%c0_23, %c0_24] : memref<128x32xf32, #tpu.memory_space<vmem>>, vector<128x32xf32>
      tpu.vector_store %arg8[%c0_23, %c0_24], %34 {strides = array<i32>} : memref<128x32xf32, #tpu.memory_space<vmem>>, vector<128x32xf32>,
    } else {
    }
    %c16_i32 = arith.constant 16 : i32
    %3 = arith.muli %arg1, %c16_i32 : i32
    %c0 = arith.constant 0 : index
    %c0_1 = arith.constant 0 : index
    %4 = vector.load %arg2[%c0, %c0_1] : memref<128x1xi32, #tpu.memory_space<vmem>>, vector<128x1xi32>
    %5 = vector.broadcast %3 : i32 to vector<128x1xi32>
    %6 = arith.subi %4, %5 : vector<128x1xi32>
    %c0_2 = arith.constant 0 : index
    %c0_3 = arith.constant 0 : index
    %7 = vector.load %arg3[%c0_2, %c0_3] : memref<128x1xi32, #tpu.memory_space<vmem>>, vector<128x1xi32>
    %8 = vector.broadcast %3 : i32 to vector<128x1xi32>
    %9 = arith.subi %7, %8 : vector<128x1xi32>
    %10 = tpu.iota {dimensions = array<i32: 1>} : vector<128x16xi32>
    %11 = vector.broadcast %6 : vector<128x1xi32> to vector<128x16xi32>
    %12 = arith.cmpi eq, %10, %11 : vector<128x16xi32>
    %13 = arith.extui %12 : vector<128x16xi1> to vector<128x16xi32>
    %14 = arith.sitofp %13 : vector<128x16xi32> to vector<128x16xf32>
    %15 = vector.broadcast %9 : vector<128x1xi32> to vector<128x16xi32>
    %16 = arith.cmpi eq, %10, %15 : vector<128x16xi32>
    %17 = arith.extui %16 : vector<128x16xi1> to vector<128x16xi32>
    %18 = arith.sitofp %17 : vector<128x16xi32> to vector<128x16xf32>
    %c0_4 = arith.constant 0 : index
    %c0_5 = arith.constant 0 : index
    %19 = vector.load %arg7[%c0_4, %c0_5] : memref<128x32xf32, #tpu.memory_space<vmem>>, vector<128x32xf32>
    %c0_6 = arith.constant 0 : index
    %c0_7 = arith.constant 0 : index
    %20 = vector.load %arg4[%c0_6, %c0_7] : memref<16x32xf32, #tpu.memory_space<vmem>>, vector<16x32xf32>
    %cst = arith.constant dense<0.000000e+00> : vector<128x32xf32>
    %21 = tpu.matmul %14, %20, %cst {dimension_numbers = #tpu.dot_dimension_numbers<[1], [0], [0], [1], [0, 0, 1, 1], [], []>} : vector<128x16xf32>, vector<16x32xf32>, vector<128x32xf32> -> vector<128x32xf32>
    %22 = arith.addf %19, %21 : vector<128x32xf32>
    %c0_8 = arith.constant 0 : index
    %c0_9 = arith.constant 0 : index
    %23 = vector.load %arg7[%c0_8, %c0_9] : memref<128x32xf32, #tpu.memory_space<vmem>>, vector<128x32xf32>
    tpu.vector_store %arg7[%c0_8, %c0_9], %22 {strides = array<i32>} : memref<128x32xf32, #tpu.memory_space<vmem>>, vector<128x32xf32>,
    %c0_10 = arith.constant 0 : index
    %c0_11 = arith.constant 0 : index
    %24 = vector.load %arg8[%c0_10, %c0_11] : memref<128x32xf32, #tpu.memory_space<vmem>>, vector<128x32xf32>
    %c0_12 = arith.constant 0 : index
    %c0_13 = arith.constant 0 : index
    %25 = vector.load %arg5[%c0_12, %c0_13] : memref<16x32xf32, #tpu.memory_space<vmem>>, vector<16x32xf32>
    %cst_14 = arith.constant dense<0.000000e+00> : vector<128x32xf32>
    %26 = tpu.matmul %18, %25, %cst_14 {dimension_numbers = #tpu.dot_dimension_numbers<[1], [0], [0], [1], [0, 0, 1, 1], [], []>} : vector<128x16xf32>, vector<16x32xf32>, vector<128x32xf32> -> vector<128x32xf32>
    %27 = arith.addf %24, %26 : vector<128x32xf32>
    %c0_15 = arith.constant 0 : index
    %c0_16 = arith.constant 0 : index
    %28 = vector.load %arg8[%c0_15, %c0_16] : memref<128x32xf32, #tpu.memory_space<vmem>>, vector<128x32xf32>
    tpu.vector_store %arg8[%c0_15, %c0_16], %27 {strides = array<i32>} : memref<128x32xf32, #tpu.memory_space<vmem>>, vector<128x32xf32>,
    %c0_i32_17 = arith.constant 0 : i32
    %29 = arith.cmpi eq, %arg1, %c0_i32_17 : i32
    %30 = arith.extui %29 : i1 to i32
    %c0_i32_18 = arith.constant 0 : i32
    %31 = arith.cmpi ne, %30, %c0_i32_18 : i32
    scf.if %31 {
      %c0_19 = arith.constant 0 : index
      %c0_20 = arith.constant 0 : index
      %32 = vector.load %arg7[%c0_19, %c0_20] : memref<128x32xf32, #tpu.memory_space<vmem>>, vector<128x32xf32>
      %c0_21 = arith.constant 0 : index
      %c0_22 = arith.constant 0 : index
      %33 = vector.load %arg8[%c0_21, %c0_22] : memref<128x32xf32, #tpu.memory_space<vmem>>, vector<128x32xf32>
      %34 = arith.mulf %32, %33 : vector<128x32xf32>
      %cst_23 = arith.constant dense<0.000000e+00> : vector<128xf32>
      %35 = vector.multi_reduction <add>, %34, %cst_23 [1] : vector<128x32xf32> to vector<128xf32>
      %36 = arith.mulf %32, %32 : vector<128x32xf32>
      %cst_24 = arith.constant dense<0.000000e+00> : vector<128xf32>
      %37 = vector.multi_reduction <add>, %36, %cst_24 [1] : vector<128x32xf32> to vector<128xf32>
      %38 = arith.mulf %33, %33 : vector<128x32xf32>
      %cst_25 = arith.constant dense<0.000000e+00> : vector<128xf32>
      %39 = vector.multi_reduction <add>, %38, %cst_25 [1] : vector<128x32xf32> to vector<128xf32>
      %cst_26 = arith.constant 9.99999996E-13 : f32
      %40 = vector.broadcast %cst_26 : f32 to vector<128xf32>
      %41 = arith.maximumf %37, %40 : vector<128xf32>
      %42 = math.rsqrt %41 : vector<128xf32>
      %cst_27 = arith.constant 9.99999996E-13 : f32
      %43 = vector.broadcast %cst_27 : f32 to vector<128xf32>
      %44 = arith.maximumf %39, %43 : vector<128xf32>
      %45 = math.rsqrt %44 : vector<128xf32>
      %cst_28 = arith.constant 1.000000e+02 : f32
      %46 = vector.broadcast %cst_28 : f32 to vector<128xf32>
      %47 = arith.mulf %46, %35 : vector<128xf32>
      %48 = arith.mulf %47, %42 : vector<128xf32>
      %49 = arith.mulf %48, %45 : vector<128xf32>
      %cst_29 = arith.constant 0.000000e+00 : f32
      %50 = vector.broadcast %cst_29 : f32 to vector<128xf32>
      %51 = arith.minimumf %49, %50 : vector<128xf32>
      %52 = math.absf %49 : vector<128xf32>
      %cst_30 = arith.constant 0.000000e+00 : f32
      %53 = vector.broadcast %cst_30 : f32 to vector<128xf32>
      %54 = arith.subf %53, %52 : vector<128xf32>
      %55 = math.exp %54 : vector<128xf32>
      %cst_31 = arith.constant 1.000000e+00 : f32
      %56 = vector.broadcast %cst_31 : f32 to vector<128xf32>
      %57 = arith.addf %56, %55 : vector<128xf32>
      %58 = math.log %57 : vector<128xf32>
      %59 = arith.subf %51, %58 : vector<128xf32>
      %60 = vector.shape_cast %59 : vector<128xf32> to vector<1x128xf32>
      %c0_32 = arith.constant 0 : index
      %c0_33 = arith.constant 0 : index
      %61 = vector.load %arg6[%c0_32, %c0_33] : memref<1x128xf32, #tpu.memory_space<vmem>>, vector<1x128xf32>
      tpu.vector_store %arg6[%c0_32, %c0_33], %60 {strides = array<i32>} : memref<1x128xf32, #tpu.memory_space<vmem>>, vector<1x128xf32>,
    } else {
    }
    return
  }
  func.func @transform_0(%arg0: i32, %arg1: i32) -> (i32, i32) {
    %c0_i32 = arith.constant 0 : i32
    %c0_i32_0 = arith.constant 0 : i32
    return %arg0, %c0_i32 : i32, i32
  }
  func.func @transform_1(%arg0: i32, %arg1: i32) -> (i32, i32) {
    %c0_i32 = arith.constant 0 : i32
    %c0_i32_0 = arith.constant 0 : i32
    return %arg0, %c0_i32 : i32, i32
  }
  func.func @transform_2(%arg0: i32, %arg1: i32) -> (i32, i32) {
    %c0_i32 = arith.constant 0 : i32
    %c0_i32_0 = arith.constant 0 : i32
    return %arg1, %c0_i32 : i32, i32
  }
  func.func @transform_3(%arg0: i32, %arg1: i32) -> (i32, i32) {
    %c0_i32 = arith.constant 0 : i32
    %c0_i32_0 = arith.constant 0 : i32
    return %arg1, %c0_i32 : i32, i32
  }
  func.func @transform_4(%arg0: i32, %arg1: i32) -> (i32, i32) {
    %c0_i32 = arith.constant 0 : i32
    %c0_i32_0 = arith.constant 0 : i32
    return %c0_i32, %arg0 : i32, i32
  }
}

</mosaic_0001>

<bundles_post_ra>
// kernel: tpu_custom_call.1
= control target key start
LH: loop header
LB: loop body
LE: loop exit
PB: predicated region body
PF: predicated region fallthrough
CT: control target
= control target key end

     0   :  { %v1738_v2 = vmov 0   ;;  %s2279_s0 = inlined_call_operand.vmem [shape: s32[128,1], index: 0, kind: input, shape index: {}]   ;;  %s2280_s1 = inlined_call_operand.vmem [shape: s32[128,1], index: 1, kind: input, shape index: {}]   ;;  %s2281_s2 = inlined_call_operand.vmem [shape: f32[16,32], index: 2, kind: input, shape index: {}]   ;;  %s2282_s3 = inlined_call_operand.vmem [shape: f32[16,32], index: 3, kind: input, shape index: {}]   ;;  %s2283_s4 = inlined_call_operand.hbm [shape: f32[1,128], index: 4, kind: output, shape index: {}]  }
   0x1   :  { %v89_v0 = vld [vmem:[%s2280_s1] sm:$0xff]  ;;  %1587 = vset.pattern.permute.xlu1 %v1738_v2  ;;  %1586 = vset.pattern.permute.xlu0 %v1738_v2  ;;  %v90_v3 = vld [vmem:[%s2280_s1 + $0x8] sm:$0xff]  ;;  %v59_v5 = vld [vmem:[%s2279_s0 + $0x18] sm:$0xff] }
   0x2   :  { %v56_v1 = vld [vmem:[%s2279_s0] sm:$0xff]  ;;  %220 = vperm.xlu1 %1587, %v89_v0   ;;  %v57_v4 = vld [vmem:[%s2279_s0 + $0x8] sm:$0xff]  ;;  %v58_v6 = vld [vmem:[%s2279_s0 + $0x10] sm:$0xff] }
   0x3   :  { %124 = vperm.xlu0 %1586, %v56_v1   ;;  %v92_v7 = vld [vmem:[%s2280_s1 + $0x18] sm:$0xff]  ;;  %v332_v8 = vld [vmem:[%s2281_s2 + $0x8] sm:$0xff]  ;;  %v91_v9 = vld [vmem:[%s2280_s1 + $0x10] sm:$0xff] }
   0x4   :  { %1527 = vmatprep.subr.mxu0 %v332_v8  ;;  %v577_v10 = vld [vmem:[%s2282_s3 + $0x8] sm:$0xff]  ;;  %v331_v11 = vld [vmem:[%s2281_s2] sm:$0xff] }
   0x5   :  { %1555 = vmatprep.subr.mxu1 %v577_v10  ;;  %1528 = vmatpush3.msra.mxu0 %v332_v8  ;;  %v576_v12 = vld [vmem:[%s2282_s3] sm:$0xff] }
   0x6   :  { %223 = vperm.xlu1 %1587, %v90_v3  }
   0x7   :  { %127 = vperm.xlu0 %1586, %v57_v4  }
   0xa   :  { %133 = vperm.xlu1 %1587, %v59_v5  }
   0xb   :  { %130 = vperm.xlu0 %1586, %v58_v6  }
   0xc   :  { %9 = vsyncpa [#allocation5], 0  ;;  %1556 = vmatpush3.msra.mxu1 %v577_v10  ;;  %1529 = vmatprep.subr.mxu0 %v331_v11  ;;  %v61_v13 = vld [vmem:[%s2279_s0 + $0x28] sm:$0xff]  ;;  %v60_v14 = vld [vmem:[%s2279_s0 + $0x20] sm:$0xff]  ;;  %vm22_vm0 = vcmask 261120   ;;  %v1739_v37 = vmov 0.0   ;;  %v121_v38 = vlaneseq }
   0xd   :  { %1557 = vmatprep.subr.mxu1 %v576_v12  ;;  %1530 = vmatpush3.msra.mxu0 %v331_v11  ;;  %v94_v15 = vld [vmem:[%s2280_s1 + $0x28] sm:$0xff]  ;;  %v93_v16 = vld [vmem:[%s2280_s1 + $0x20] sm:$0xff]  ;;  %v63_v17 = vld [vmem:[%s2279_s0 + $0x38] sm:$0xff]  ;;  %24 = vst.msk [vmem:[#allocation2 + $0x8] sm:$0xff] %vm22_vm0, %v1739_v37  ;;  %vm333_vm1 = vcmask 130048  }
   0xe   :  { %229 = vperm.xlu1 %1587, %v92_v7   ;;  %1558 = vmatpush3.msra.mxu1 %v576_v12  ;;  %v62_v18 = vld [vmem:[%s2279_s0 + $0x30] sm:$0xff]  ;;  %v96_v19 = vld [vmem:[%s2280_s1 + $0x38] sm:$0xff]  ;;  %v65_v21 = vld [vmem:[%s2279_s0 + $0x48] sm:$0xff]  ;;  %23 = vst.msk [vmem:[#allocation2] sm:$0xff] %vm22_vm0, %v1739_v37  ;;  %v1939_v39 = vand.u32 127, %v121_v38 }
   0xf   :  { %226 = vperm.xlu0 %1586, %v91_v9   ;;  %v95_v20 = vld [vmem:[%s2280_s1 + $0x30] sm:$0xff]  ;;  %v64_v22 = vld [vmem:[%s2279_s0 + $0x40] sm:$0xff]  ;;  %v98_v23 = vld [vmem:[%s2280_s1 + $0x48] sm:$0xff]  ;;  %25 = vst.msk [vmem:[#allocation2 + $0x10] sm:$0xff] %vm22_vm0, %v1739_v37 }
  0x10   :  { %v97_v24 = vld [vmem:[%s2280_s1 + $0x40] sm:$0xff]  ;;  %v67_v25 = vld [vmem:[%s2279_s0 + $0x58] sm:$0xff]  ;;  %v66_v26 = vld [vmem:[%s2279_s0 + $0x50] sm:$0xff]  ;;  %26 = vst.msk [vmem:[#allocation2 + $0x18] sm:$0xff] %vm22_vm0, %v1739_v37 }
  0x11   :  { %v100_v27 = vld [vmem:[%s2280_s1 + $0x58] sm:$0xff]  ;;  %v99_v28 = vld [vmem:[%s2280_s1 + $0x50] sm:$0xff]  ;;  %v69_v29 = vld [vmem:[%s2279_s0 + $0x68] sm:$0xff]  ;;  %27 = vst.msk [vmem:[#allocation2 + $0x20] sm:$0xff] %vm22_vm0, %v1739_v37 }
  0x12   :  { %139 = vperm.xlu1 %1587, %v61_v13   ;;  %v68_v30 = vld [vmem:[%s2279_s0 + $0x60] sm:$0xff]  ;;  %v102_v31 = vld [vmem:[%s2280_s1 + $0x68] sm:$0xff]  ;;  %v71_v33 = vld [vmem:[%s2279_s0 + $0x78] sm:$0xff]  ;;  %28 = vst.msk [vmem:[#allocation2 + $0x28] sm:$0xff] %vm22_vm0, %v1739_v37 }
  0x13   :  { %136 = vperm.xlu0 %1586, %v60_v14   ;;  %v101_v32 = vld [vmem:[%s2280_s1 + $0x60] sm:$0xff]  ;;  %v70_v34 = vld [vmem:[%s2279_s0 + $0x70] sm:$0xff]  ;;  %v104_v35 = vld [vmem:[%s2280_s1 + $0x78] sm:$0xff]  ;;  %29 = vst.msk [vmem:[#allocation2 + $0x30] sm:$0xff] %vm22_vm0, %v1739_v37  ;;  %s1740_s0 = smov [#allocation4]  }
  0x14   :  { %v103_v36 = vld [vmem:[%s2280_s1 + $0x70] sm:$0xff]  ;;  %30 = vst.msk [vmem:[#allocation2 + $0x38] sm:$0xff] %vm22_vm0, %v1739_v37  ;;  %31 = vst.msk [vmem:[#allocation2 + $0x40] sm:$0xff] %vm22_vm0, %v1739_v37  ;;  %s1419_s1 = sshll.u32 %s1740_s0, 4  ;;  %s1420_s1 = int_to_ptr.vmem [resolvable:$true] %s1419_s1 }
  0x15   :  { %32 = vst.msk [vmem:[#allocation2 + $0x48] sm:$0xff] %vm22_vm0, %v1739_v37  ;;  %33 = vst.msk [vmem:[#allocation2 + $0x50] sm:$0xff] %vm22_vm0, %v1739_v37  ;;  %s1716_s5 = scalar_lea.vmem %s1420_s1, 16  ;;  %s1720_s6 = scalar_lea.vmem %s1420_s1, 32 }
  0x16   :  { %235 = vperm.xlu1 %1587, %v94_v15   ;;  %34 = vst.msk [vmem:[#allocation2 + $0x58] sm:$0xff] %vm22_vm0, %v1739_v37  ;;  %35 = vst.msk [vmem:[#allocation2 + $0x60] sm:$0xff] %vm22_vm0, %v1739_v37  ;;  %p1717_p0 = scmp.ne.s32.totalorder %s1420_s1, %s1716_s5  ;;  %p1721_p1 = scmp.lt.s32.totalorder %s1420_s1, %s1420_s1 }
  0x17   :  { %232 = vperm.xlu0 %1586, %v93_v16   ;;  %36 = vst.msk [vmem:[#allocation2 + $0x68] sm:$0xff] %vm22_vm0, %v1739_v37  ;;  %37 = vst.msk [vmem:[#allocation2 + $0x70] sm:$0xff] %vm22_vm0, %v1739_v37  ;;  %p1722_p2 = scmp.lt.s32.totalorder %s1720_s6, %s1716_s5 }
  0x18   :  { %38 = vst.msk [vmem:[#allocation2 + $0x78] sm:$0xff] %vm22_vm0, %v1739_v37  ;;  %39 = vst.msk [vmem:[#allocation3] sm:$0xff] %vm22_vm0, %v1739_v37 }
  0x19   :  { %40 = vst.msk [vmem:[#allocation3 + $0x8] sm:$0xff] %vm22_vm0, %v1739_v37  ;;  %41 = vst.msk [vmem:[#allocation3 + $0x10] sm:$0xff] %vm22_vm0, %v1739_v37  ;;  %p1723_p3 = por %p1722_p2, %p1721_p1 }
  0x1a   :  { %145 = vperm.xlu1 %1587, %v63_v17   ;;  %42 = vst.msk [vmem:[#allocation3 + $0x18] sm:$0xff] %vm22_vm0, %v1739_v37  ;;  %43 = vst.msk [vmem:[#allocation3 + $0x20] sm:$0xff] %vm22_vm0, %v1739_v37 }
  0x1b   :  { %142 = vperm.xlu0 %1586, %v62_v18   ;;  %44 = vst.msk [vmem:[#allocation3 + $0x28] sm:$0xff] %vm22_vm0, %v1739_v37  ;;  %45 = vst.msk [vmem:[#allocation3 + $0x30] sm:$0xff] %vm22_vm0, %v1739_v37  ;;  %p1724_p4 = pnand %p1723_p3, %p1717_p0 }
  0x1c   :  { %46 = vst.msk [vmem:[#allocation3 + $0x38] sm:$0xff] %vm22_vm0, %v1739_v37  ;;  %47 = vst.msk [vmem:[#allocation3 + $0x40] sm:$0xff] %vm22_vm0, %v1739_v37 }
  0x1d   :  { %48 = vst.msk [vmem:[#allocation3 + $0x48] sm:$0xff] %vm22_vm0, %v1739_v37  ;;  %49 = vst.msk [vmem:[#allocation3 + $0x50] sm:$0xff] %vm22_vm0, %v1739_v37 }
  0x1e   :  { %241 = vperm.xlu1 %1587, %v96_v19   ;;  %50 = vst.msk [vmem:[#allocation3 + $0x58] sm:$0xff] %vm22_vm0, %v1739_v37  ;;  %51 = vst.msk [vmem:[#allocation3 + $0x60] sm:$0xff] %vm22_vm0, %v1739_v37 }
  0x1f   :  { %238 = vperm.xlu0 %1586, %v95_v20   ;;  %52 = vst.msk [vmem:[#allocation3 + $0x68] sm:$0xff] %vm22_vm0, %v1739_v37  ;;  %53 = vst.msk [vmem:[#allocation3 + $0x70] sm:$0xff] %vm22_vm0, %v1739_v37 }
  0x20   :  { %54 = vst.msk [vmem:[#allocation3 + $0x78] sm:$0xff] %vm22_vm0, %v1739_v37 }
  0x22   :  { %151 = vperm.xlu1 %1587, %v65_v21  }
  0x23   :  { %148 = vperm.xlu0 %1586, %v64_v22  }
  0x26   :  { %247 = vperm.xlu1 %1587, %v98_v23  }
  0x27   :  { %244 = vperm.xlu0 %1586, %v97_v24  }
  0x2a   :  { %157 = vperm.xlu1 %1587, %v67_v25  }
  0x2b   :  { %154 = vperm.xlu0 %1586, %v66_v26  }
  0x2e   :  { %253 = vperm.xlu1 %1587, %v100_v27  }
  0x2f   :  { %250 = vperm.xlu0 %1586, %v99_v28  }
  0x32   :  { %163 = vperm.xlu1 %1587, %v69_v29  }
  0x33   :  { %160 = vperm.xlu0 %1586, %v68_v30  }
  0x36   :  { %259 = vperm.xlu1 %1587, %v102_v31  }
  0x37   :  { %256 = vperm.xlu0 %1586, %v101_v32  }
  0x3a   :  { %169 = vperm.xlu1 %1587, %v71_v33  }
  0x3b   :  { %166 = vperm.xlu0 %1586, %v70_v34  }
  0x3e   :  { %265 = vperm.xlu1 %1587, %v104_v35  }
  0x3f   :  { %262 = vperm.xlu0 %1586, %v103_v36  }
  0x7d   :  { %v221_v40 = vpop.permute.xlu1 %220 }
  0x7e   :  { %v125_v41 = vpop.permute.xlu0 %124  ;;  %vm267_vm2 = vcmp.eq.s32.totalorder %v1939_v39, %v221_v40 }
  0x7f   :  { %vm171_vm3 = vcmp.eq.s32.totalorder %v1939_v39, %v125_v41  ;;  %v1443_v42 = vsel %vm267_vm2, 1.0, %v1739_v37 }
  0x80   :  { %v1427_v43 = vsel %vm171_vm3, 1.0, %v1739_v37  ;;  %1559 = vmatprep.mubr.msk.f32.mxu1 %vm333_vm1, %v1443_v42 }
  0x81   :  { %1531 = vmatprep.mubr.msk.f32.mxu0 %vm333_vm1, %v1427_v43  ;;  %v224_v44 = vpop.permute.xlu1 %223  ;;  %v316_v43 = vld [vmem:[#allocation2 + $0x8] sm:$0xff] }
  0x82   :  { %v128_v45 = vpop.permute.xlu0 %127  ;;  %vm268_vm4 = vcmp.eq.s32.totalorder %v1939_v39, %v224_v44  ;;  %v561_v44 = vld [vmem:[#allocation3 + $0x8] sm:$0xff] }
  0x83   :  { %vm172_vm5 = vcmp.eq.s32.totalorder %v1939_v39, %v128_v45  ;;  %v1444_v46 = vsel %vm268_vm4, 1.0, %v1739_v37 }
  0x84   :  { %v1428_v47 = vsel %vm172_vm5, 1.0, %v1739_v37  ;;  %1560 = vmatmul.mubr.msk.f32.vlgmr.msra.gmra.mxu1 %vm333_vm1, %v1444_v46 }
  0x85   :  { %1532 = vmatmul.mubr.msk.f32.vlgmr.msra.gmra.mxu0 %vm333_vm1, %v1428_v47  ;;  %v134_v48 = vpop.permute.xlu1 %133  ;;  %v315_v47 = vld [vmem:[#allocation2] sm:$0xff] }
  0x86   :  { %v131_v49 = vpop.permute.xlu0 %130  ;;  %vm174_vm6 = vcmp.eq.s32.totalorder %v1939_v39, %v134_v48  ;;  %v560_v48 = vld [vmem:[#allocation3] sm:$0xff] }
  0x87   :  { %vm173_vm7 = vcmp.eq.s32.totalorder %v1939_v39, %v131_v49  ;;  %v1430_v50 = vsel %vm174_vm6, 1.0, %v1739_v37 }
  0x88   :  { %v1429_v51 = vsel %vm173_vm7, 1.0, %v1739_v37 }
  0x89   :  { %1534 = vmatprep.mubr.msk.f32.mxu0 %vm333_vm1, %v1429_v51  ;;  %v230_v52 = vpop.permute.xlu1 %229 }
  0x8a   :  { %v227_v53 = vpop.permute.xlu0 %226  ;;  %1535 = vmatmul.mubr.msk.f32.gmra.mxu0 %vm333_vm1, %v1430_v50  ;;  %vm270_vm8 = vcmp.eq.s32.totalorder %v1939_v39, %v230_v52 }
  0x8b   :  { %vm269_vm9 = vcmp.eq.s32.totalorder %v1939_v39, %v227_v53  ;;  %v1446_v54 = vsel %vm270_vm8, 1.0, %v1739_v37 }
  0x8c   :  { %v1445_v55 = vsel %vm269_vm9, 1.0, %v1739_v37 }
  0x8d   :  { %1562 = vmatprep.mubr.msk.f32.mxu1 %vm333_vm1, %v1445_v55  ;;  %v140_v56 = vpop.permute.xlu1 %139 }
  0x8e   :  { %v137_v57 = vpop.permute.xlu0 %136  ;;  %1563 = vmatmul.mubr.msk.f32.gmra.mxu1 %vm333_vm1, %v1446_v54  ;;  %vm176_vm10 = vcmp.eq.s32.totalorder %v1939_v39, %v140_v56  ;;  %v318_v54 = vld [vmem:[#allocation2 + $0x18] sm:$0xff]  ;;  %v317_v56 = vld [vmem:[#allocation2 + $0x10] sm:$0xff] }
  0x8f   :  { %vm175_vm11 = vcmp.eq.s32.totalorder %v1939_v39, %v137_v57  ;;  %v1432_v58 = vsel %vm176_vm10, 1.0, %v1739_v37 }
  0x90   :  { %v1431_v59 = vsel %vm175_vm11, 1.0, %v1739_v37 }
  0x91   :  { %1537 = vmatprep.mubr.msk.f32.mxu0 %vm333_vm1, %v1431_v59  ;;  %v236_v60 = vpop.permute.xlu1 %235  ;;  %v563_v59 = vld [vmem:[#allocation3 + $0x18] sm:$0xff] }
  0x92   :  { %v233_v61 = vpop.permute.xlu0 %232  ;;  %1538 = vmatmul.mubr.msk.f32.gmra.mxu0 %vm333_vm1, %v1432_v58  ;;  %vm272_vm12 = vcmp.eq.s32.totalorder %v1939_v39, %v236_v60 }
  0x93   :  { %vm271_vm13 = vcmp.eq.s32.totalorder %v1939_v39, %v233_v61  ;;  %v1448_v62 = vsel %vm272_vm12, 1.0, %v1739_v37 }
  0x94   :  { %v1447_v63 = vsel %vm271_vm13, 1.0, %v1739_v37 }
  0x95   :  { %1565 = vmatprep.mubr.msk.f32.mxu1 %vm333_vm1, %v1447_v63  ;;  %v146_v0 = vpop.permute.xlu1 %145 }
  0x96   :  { %v143_v1 = vpop.permute.xlu0 %142  ;;  %1566 = vmatmul.mubr.msk.f32.gmra.mxu1 %vm333_vm1, %v1448_v62  ;;  %vm178_vm14 = vcmp.eq.s32.totalorder %v1939_v39, %v146_v0  ;;  %v562_v62 = vld [vmem:[#allocation3 + $0x10] sm:$0xff] }
  0x97   :  { %vm177_vm15 = vcmp.eq.s32.totalorder %v1939_v39, %v143_v1  ;;  %v1434_v2 = vsel %vm178_vm14, 1.0, %v1739_v37 }
  0x98   :  { %v1433_v3 = vsel %vm177_vm15, 1.0, %v1739_v37 }
  0x99   :  { %1540 = vmatprep.mubr.msk.f32.mxu0 %vm333_vm1, %v1433_v3  ;;  %v242_v4 = vpop.permute.xlu1 %241  ;;  %v320_v3 = vld [vmem:[#allocation2 + $0x28] sm:$0xff] }
  0x9a   :  { %v239_v5 = vpop.permute.xlu0 %238  ;;  %1541 = vmatmul.mubr.msk.f32.gmra.mxu0 %vm333_vm1, %v1434_v2  ;;  %vm274_vm2 = vcmp.eq.s32.totalorder %v1939_v39, %v242_v4 }
  0x9b   :  { %vm273_vm3 = vcmp.eq.s32.totalorder %v1939_v39, %v239_v5  ;;  %v1450_v6 = vsel %vm274_vm2, 1.0, %v1739_v37 }
  0x9c   :  { %v1449_v7 = vsel %vm273_vm3, 1.0, %v1739_v37 }
  0x9d   :  { %1568 = vmatprep.mubr.msk.f32.mxu1 %vm333_vm1, %v1449_v7  ;;  %v152_v8 = vpop.permute.xlu1 %151 }
  0x9e   :  { %v149_v9 = vpop.permute.xlu0 %148  ;;  %1569 = vmatmul.mubr.msk.f32.gmra.mxu1 %vm333_vm1, %v1450_v6  ;;  %vm180_vm4 = vcmp.eq.s32.totalorder %v1939_v39, %v152_v8 }
  0x9f   :  { %vm179_vm5 = vcmp.eq.s32.totalorder %v1939_v39, %v149_v9  ;;  %v1436_v10 = vsel %vm180_vm4, 1.0, %v1739_v37 }
  0xa0   :  { %v1435_v11 = vsel %vm179_vm5, 1.0, %v1739_v37 }
  0xa1   :  { %1543 = vmatprep.mubr.msk.f32.mxu0 %vm333_vm1, %v1435_v11  ;;  %v248_v12 = vpop.permute.xlu1 %247  ;;  %v319_v11 = vld [vmem:[#allocation2 + $0x20] sm:$0xff] }
  0xa2   :  { %v245_v13 = vpop.permute.xlu0 %244  ;;  %1544 = vmatmul.mubr.msk.f32.gmra.mxu0 %vm333_vm1, %v1436_v10  ;;  %vm276_vm6 = vcmp.eq.s32.totalorder %v1939_v39, %v248_v12 }
  0xa3   :  { %vm275_vm7 = vcmp.eq.s32.totalorder %v1939_v39, %v245_v13  ;;  %v1452_v14 = vsel %vm276_vm6, 1.0, %v1739_v37  ;;  %vm1325_vm6 = vcmask 261312  }
  0xa4   :  { %v1451_v15 = vsel %vm275_vm7, 1.0, %v1739_v37  ;;  %vm1332_vm7 = vcmask 326912  }
  0xa5   :  { %1571 = vmatprep.mubr.msk.f32.mxu1 %vm333_vm1, %v1451_v15  ;;  %v158_v16 = vpop.permute.xlu1 %157 }
  0xa6   :  { %v155_v17 = vpop.permute.xlu0 %154  ;;  %1572 = vmatmul.mubr.msk.f32.gmra.mxu1 %vm333_vm1, %v1452_v14  ;;  %vm182_vm8 = vcmp.eq.s32.totalorder %v1939_v39, %v158_v16 }
  0xa7   :  { %vm181_vm9 = vcmp.eq.s32.totalorder %v1939_v39, %v155_v17  ;;  %v1438_v18 = vsel %vm182_vm8, 1.0, %v1739_v37  ;;  %v565_v17 = vld [vmem:[#allocation3 + $0x28] sm:$0xff]  ;;  %vm1339_vm8 = vcmask 392512  }
  0xa8   :  { %v1437_v19 = vsel %vm181_vm9, 1.0, %v1739_v37  ;;  %vm1346_vm9 = vcmask 458112  }
  0xa9   :  { %1546 = vmatprep.mubr.msk.f32.mxu0 %vm333_vm1, %v1437_v19  ;;  %v254_v20 = vpop.permute.xlu1 %253 }
  0xaa   :  { %v251_v21 = vpop.permute.xlu0 %250  ;;  %1547 = vmatmul.mubr.msk.f32.gmra.mxu0 %vm333_vm1, %v1438_v18  ;;  %vm278_vm10 = vcmp.eq.s32.totalorder %v1939_v39, %v254_v20 }
  0xab   :  { %vm277_vm11 = vcmp.eq.s32.totalorder %v1939_v39, %v251_v21  ;;  %v1454_v22 = vsel %vm278_vm10, 1.0, %v1739_v37  ;;  %vm1353_vm10 = vcmask 523712  }
  0xac   :  { %v1453_v23 = vsel %vm277_vm11, 1.0, %v1739_v37  ;;  %vm1360_vm11 = vcmask 589312  }
  0xad   :  { %1574 = vmatprep.mubr.msk.f32.mxu1 %vm333_vm1, %v1453_v23  ;;  %v164_v24 = vpop.permute.xlu1 %163 }
  0xae   :  { %v161_v25 = vpop.permute.xlu0 %160  ;;  %1575 = vmatmul.mubr.msk.f32.gmra.mxu1 %vm333_vm1, %v1454_v22  ;;  %vm184_vm12 = vcmp.eq.s32.totalorder %v1939_v39, %v164_v24  ;;  %v564_v22 = vld [vmem:[#allocation3 + $0x20] sm:$0xff] }
  0xaf   :  { %vm183_vm13 = vcmp.eq.s32.totalorder %v1939_v39, %v161_v25  ;;  %v1440_v26 = vsel %vm184_vm12, 1.0, %v1739_v37  ;;  %vm1367_vm12 = vcmask 654912  }
  0xb0   :  { %v1439_v27 = vsel %vm183_vm13, 1.0, %v1739_v37  ;;  %vm1374_vm13 = vcmask 720512  }
  0xb1   :  { %1549 = vmatprep.mubr.msk.f32.mxu0 %vm333_vm1, %v1439_v27  ;;  %v260_v28 = vpop.permute.xlu1 %259 }
  0xb2   :  { %v257_v29 = vpop.permute.xlu0 %256  ;;  %1550 = vmatmul.mubr.msk.f32.gmra.mxu0 %vm333_vm1, %v1440_v26  ;;  %vm280_vm14 = vcmp.eq.s32.totalorder %v1939_v39, %v260_v28  ;;  %v322_v28 = vld [vmem:[#allocation2 + $0x38] sm:$0xff] }
  0xb3   :  { %vm279_vm15 = vcmp.eq.s32.totalorder %v1939_v39, %v257_v29  ;;  %v1456_v30 = vsel %vm280_vm14, 1.0, %v1739_v37  ;;  %vm1381_vm14 = vcmask 786112  }
  0xb4   :  { %v1455_v31 = vsel %vm279_vm15, 1.0, %v1739_v37  ;;  %vm1388_vm15 = vcmask 851712  }
  0xb5   :  { %1577 = vmatprep.mubr.msk.f32.mxu1 %vm333_vm1, %v1455_v31  ;;  %v170_v32 = vpop.permute.xlu1 %169 }
  0xb6   :  { %v167_v33 = vpop.permute.xlu0 %166  ;;  %1578 = vmatmul.mubr.msk.f32.gmra.mxu1 %vm333_vm1, %v1456_v30  ;;  %vm186_vm2 = vcmp.eq.s32.totalorder %v1939_v39, %v170_v32 }
  0xb7   :  { %vm185_vm3 = vcmp.eq.s32.totalorder %v1939_v39, %v167_v33  ;;  %v1442_v34 = vsel %vm186_vm2, 1.0, %v1739_v37  ;;  %vm1395_vm2 = vcmask 917312  }
  0xb8   :  { %v1441_v35 = vsel %vm185_vm3, 1.0, %v1739_v37  ;;  %vm1402_vm3 = vcmask 982912  }
  0xb9   :  { %1552 = vmatprep.mubr.msk.f32.mxu0 %vm333_vm1, %v1441_v35  ;;  %v266_v36 = vpop.permute.xlu1 %265 }
  0xba   :  { %v263_v40 = vpop.permute.xlu0 %262  ;;  %1553 = vmatmul.mubr.msk.f32.gmra.mxu0 %vm333_vm1, %v1442_v34  ;;  %vm282_vm4 = vcmp.eq.s32.totalorder %v1939_v39, %v266_v36  ;;  %v321_v34 = vld [vmem:[#allocation2 + $0x30] sm:$0xff] }
  0xbb   :  { %vm281_vm5 = vcmp.eq.s32.totalorder %v1939_v39, %v263_v40  ;;  %v1458_v41 = vsel %vm282_vm4, 1.0, %v1739_v37  ;;  %vm1409_vm4 = vcmask 1048512  }
  0xbc   :  { %v1457_v42 = vsel %vm281_vm5, 1.0, %v1739_v37 }
  0xbd   :  { %1580 = vmatprep.mubr.msk.f32.mxu1 %vm333_vm1, %v1457_v42 }
  0xbe   :  { %1581 = vmatmul.mubr.msk.f32.gmra.mxu1 %vm333_vm1, %v1458_v41  ;;  %vm1318_vm1 = vcmask 195712  }
 0x144   :  { %v1561_v46 = vpop.f32.mrf.mxu1 }
 0x145   :  { %v1533_v45 = vpop.f32.mrf.mxu0  ;;  %v772_v50 = vadd.f32 %v1561_v46, %v561_v44 }
 0x146   :  { %v528_v49 = vadd.f32 %v1533_v45, %v316_v43  ;;  %v692_v52 = vpop.f32.mrf.mxu1  ;;  %v567_v43 = vld [vmem:[#allocation3 + $0x38] sm:$0xff] }
 0x147   :  { %v448_v51 = vpop.f32.mrf.mxu0  ;;  %788 = vst.msk [vmem:[#allocation3 + $0x8] sm:$0xff] %vm22_vm0, %v772_v50  ;;  %v771_v37 = vadd.f32 %v692_v52, %v560_v48 }
 0x148   :  { %545 = vst.msk [vmem:[#allocation2 + $0x8] sm:$0xff] %vm22_vm0, %v528_v49  ;;  %v527_v53 = vadd.f32 %v448_v51, %v315_v47  ;;  %v566_v49 = vld [vmem:[#allocation3 + $0x30] sm:$0xff] }
 0x149   :  { %787 = vst.msk [vmem:[#allocation3] sm:$0xff] %vm22_vm0, %v771_v37 }
 0x14a   :  { %544 = vst.msk [vmem:[#allocation2] sm:$0xff] %vm22_vm0, %v527_v53  ;;  %v1536_v55 = vpop.f32.mrf.mxu0 }
 0x14b   :  { %v530_v57 = vadd.f32 %v1536_v55, %v318_v54  ;;  %v324_v54 = vld [vmem:[#allocation2 + $0x48] sm:$0xff] }
 0x14c   :  { %v458_v58 = vpop.f32.mrf.mxu0 }
 0x14d   :  { %547 = vst.msk [vmem:[#allocation2 + $0x18] sm:$0xff] %vm22_vm0, %v530_v57  ;;  %v529_v60 = vadd.f32 %v458_v58, %v317_v56 }
 0x14e   :  { %v1564_v61 = vpop.f32.mrf.mxu1  ;;  %v823_v0 = vld [vmem:[#allocation3 + $0x8] sm:$0xff] }
 0x14f   :  { %546 = vst.msk [vmem:[#allocation2 + $0x10] sm:$0xff] %vm22_vm0, %v529_v60  ;;  %v774_v63 = vadd.f32 %v1564_v61, %v563_v59  ;;  %v807_v1 = vld [vmem:[#allocation2 + $0x8] sm:$0xff]  ;;  %v967_v4 = vmul.f32 %v823_v0, %v823_v0  ;;  %v323_v59 = vld [vmem:[#allocation2 + $0x40] sm:$0xff] }
 0x150   :  { %v702_v2 = vpop.f32.mrf.mxu1  ;;  %v903_v5 = vmul.f32 %v807_v1, %v807_v1  ;;  %v822_v7 = vld [vmem:[#allocation3] sm:$0xff]  ;;  %v839_v13 = vmul.f32 %v823_v0, %v807_v1  ;;  %v569_v1 = vld [vmem:[#allocation3 + $0x48] sm:$0xff] }
 0x151   :  { %790 = vst.msk [vmem:[#allocation3 + $0x18] sm:$0xff] %vm22_vm0, %v774_v63  ;;  %v773_v6 = vadd.f32 %v702_v2, %v562_v62  ;;  %v985_v9 = vsel %vm22_vm0, %v967_v4, 0.0  ;;  %v966_v12 = vmul.f32 %v822_v7, %v822_v7  ;;  %v806_v15 = vld [vmem:[#allocation2] sm:$0xff] }
 0x152   :  { %v1539_v8 = vpop.f32.mrf.mxu0  ;;  %v921_v10 = vsel %vm22_vm0, %v903_v5, 0.0  ;;  %986 = vadd.xlane.f32.xlu0 %v985_v9  ;;  %v857_v21 = vsel %vm22_vm0, %v839_v13, 0.0  ;;  %v902_v23 = vmul.f32 %v806_v15, %v806_v15  ;;  %v838_v24 = vmul.f32 %v822_v7, %v806_v15  ;;  %v326_v13 = vld [vmem:[#allocation2 + $0x58] sm:$0xff] }
 0x153   :  { %789 = vst.msk [vmem:[#allocation3 + $0x10] sm:$0xff] %vm22_vm0, %v773_v6  ;;  %v532_v14 = vadd.f32 %v1539_v8, %v320_v3  ;;  %922 = vadd.xlane.f32.xlu1 %v921_v10  ;;  %v982_v20 = vsel %vm22_vm0, %v966_v12, 0.0  ;;  %v568_v6 = vld [vmem:[#allocation3 + $0x40] sm:$0xff] }
 0x154   :  { %v468_v16 = vpop.f32.mrf.mxu0  ;;  %v809_v26 = vld [vmem:[#allocation2 + $0x18] sm:$0xff]  ;;  %v918_v32 = vsel %vm22_vm0, %v902_v23, 0.0  ;;  %v854_v33 = vsel %vm22_vm0, %v838_v24, 0.0 }
 0x155   :  { %549 = vst.msk [vmem:[#allocation2 + $0x28] sm:$0xff] %vm22_vm0, %v532_v14  ;;  %v531_v18 = vadd.f32 %v468_v16, %v319_v11  ;;  %v905_v35 = vmul.f32 %v809_v26, %v809_v26  ;;  %v571_v24 = vld [vmem:[#allocation3 + $0x58] sm:$0xff] }
 0x156   :  { %v1567_v19 = vpop.f32.mrf.mxu1  ;;  %858 = vadd.xlane.f32.xlu0 %v857_v21  ;;  %v808_v45 = vld [vmem:[#allocation2 + $0x10] sm:$0xff] }
 0x157   :  { %548 = vst.msk [vmem:[#allocation2 + $0x20] sm:$0xff] %vm22_vm0, %v531_v18  ;;  %v776_v25 = vadd.f32 %v1567_v19, %v565_v17  ;;  %983 = vadd.xlane.f32.xlu1 %v982_v20  ;;  %v927_v47 = vsel %vm22_vm0, %v905_v35, 0.0  ;;  %v904_v60 = vmul.f32 %v808_v45, %v808_v45  ;;  %v325_v18 = vld [vmem:[#allocation2 + $0x50] sm:$0xff]  ;;  %v328_v35 = vld [vmem:[#allocation2 + $0x68] sm:$0xff] }
 0x158   :  { %v712_v27 = vpop.f32.mrf.mxu1  ;;  %v825_v29 = vld [vmem:[#allocation3 + $0x18] sm:$0xff] }
 0x159   :  { %792 = vst.msk [vmem:[#allocation3 + $0x28] sm:$0xff] %vm22_vm0, %v776_v25  ;;  %v775_v30 = vadd.f32 %v712_v27, %v564_v22  ;;  %v841_v36 = vmul.f32 %v825_v29, %v809_v26  ;;  %v969_v50 = vmul.f32 %v825_v29, %v825_v29  ;;  %v924_v4 = vsel %vm22_vm0, %v904_v60, 0.0  ;;  %v570_v29 = vld [vmem:[#allocation3 + $0x50] sm:$0xff]  ;;  %v330_v60 = vld [vmem:[#allocation2 + $0x78] sm:$0xff] }
 0x15a   :  { %v1542_v31 = vpop.f32.mrf.mxu0  ;;  %919 = vadd.xlane.f32.xlu0 %v918_v32  ;;  %v824_v41 = vld [vmem:[#allocation3 + $0x10] sm:$0xff] }
 0x15b   :  { %791 = vst.msk [vmem:[#allocation3 + $0x20] sm:$0xff] %vm22_vm0, %v775_v30  ;;  %v534_v40 = vadd.f32 %v1542_v31, %v322_v28  ;;  %855 = vadd.xlane.f32.xlu1 %v854_v33  ;;  %v863_v48 = vsel %vm22_vm0, %v841_v36, 0.0  ;;  %v840_v51 = vmul.f32 %v824_v41, %v808_v45  ;;  %v991_v57 = vsel %vm22_vm0, %v969_v50, 0.0  ;;  %v573_v50 = vld [vmem:[#allocation3 + $0x68] sm:$0xff] }
 0x15c   :  { %v478_v42 = vpop.f32.mrf.mxu0  ;;  %v811_v53 = vld [vmem:[#allocation2 + $0x28] sm:$0xff]  ;;  %v968_v7 = vmul.f32 %v824_v41, %v824_v41 }
 0x15d   :  { %551 = vst.msk [vmem:[#allocation2 + $0x38] sm:$0xff] %vm22_vm0, %v534_v40  ;;  %v533_v44 = vadd.f32 %v478_v42, %v321_v34  ;;  %v860_v58 = vsel %vm22_vm0, %v840_v51, 0.0  ;;  %v907_v61 = vmul.f32 %v811_v53, %v811_v53 }
 0x15e   :  { %v1570_v46 = vpop.f32.mrf.mxu1  ;;  %928 = vadd.xlane.f32.xlu0 %v927_v47  ;;  %v810_v63 = vld [vmem:[#allocation2 + $0x20] sm:$0xff]  ;;  %v988_v16 = vsel %vm22_vm0, %v968_v7, 0.0  ;;  %v575_v7 = vld [vmem:[#allocation3 + $0x78] sm:$0xff] }
 0x15f   :  { %550 = vst.msk [vmem:[#allocation2 + $0x30] sm:$0xff] %vm22_vm0, %v533_v44  ;;  %v778_v52 = vadd.f32 %v1570_v46, %v567_v43  ;;  %864 = vadd.xlane.f32.xlu1 %v863_v48  ;;  %v933_v5 = vsel %vm22_vm0, %v907_v61, 0.0  ;;  %v906_v8 = vmul.f32 %v810_v63, %v810_v63  ;;  %v327_v43 = vld [vmem:[#allocation2 + $0x60] sm:$0xff] }
 0x160   :  { %v722_v37 = vpop.f32.mrf.mxu1  ;;  %v827_v10 = vld [vmem:[#allocation3 + $0x28] sm:$0xff] }
 0x161   :  { %794 = vst.msk [vmem:[#allocation3 + $0x38] sm:$0xff] %vm22_vm0, %v778_v52  ;;  %v777_v55 = vadd.f32 %v722_v37, %v566_v49  ;;  %v930_v17 = vsel %vm22_vm0, %v906_v8, 0.0  ;;  %v971_v19 = vmul.f32 %v827_v10, %v827_v10  ;;  %v843_v30 = vmul.f32 %v827_v10, %v811_v53 }
 0x162   :  { %v1545_v56 = vpop.f32.mrf.mxu0  ;;  %992 = vadd.xlane.f32.xlu0 %v991_v57  ;;  %v826_v11 = vld [vmem:[#allocation3 + $0x20] sm:$0xff] }
 0x163   :  { %793 = vst.msk [vmem:[#allocation3 + $0x30] sm:$0xff] %vm22_vm0, %v777_v55  ;;  %v536_v62 = vadd.f32 %v1545_v56, %v324_v54  ;;  %861 = vadd.xlane.f32.xlu1 %v860_v58  ;;  %v842_v20 = vmul.f32 %v826_v11, %v810_v63  ;;  %v997_v27 = vsel %vm22_vm0, %v971_v19, 0.0  ;;  %v869_v41 = vsel %vm22_vm0, %v843_v30, 0.0  ;;  %v572_v54 = vld [vmem:[#allocation3 + $0x60] sm:$0xff] }
 0x164   :  { %v488_v0 = vpop.f32.mrf.mxu0  ;;  %v813_v22 = vld [vmem:[#allocation2 + $0x38] sm:$0xff]  ;;  %v970_v44 = vmul.f32 %v826_v11, %v826_v11 }
 0x165   :  { %553 = vst.msk [vmem:[#allocation2 + $0x48] sm:$0xff] %vm22_vm0, %v536_v62  ;;  %v535_v2 = vadd.f32 %v488_v0, %v323_v59  ;;  %v866_v28 = vsel %vm22_vm0, %v842_v20, 0.0  ;;  %v909_v31 = vmul.f32 %v813_v22, %v813_v22 }
 0x166   :  { %v1573_v3 = vpop.f32.mrf.mxu1  ;;  %925 = vadd.xlane.f32.xlu0 %v924_v4  ;;  %v812_v33 = vld [vmem:[#allocation2 + $0x30] sm:$0xff]  ;;  %v994_v53 = vsel %vm22_vm0, %v970_v44, 0.0 }
 0x167   :  { %552 = vst.msk [vmem:[#allocation2 + $0x40] sm:$0xff] %vm22_vm0, %v535_v2  ;;  %v780_v9 = vadd.f32 %v1573_v3, %v569_v1  ;;  %934 = vadd.xlane.f32.xlu1 %v933_v5  ;;  %v939_v42 = vsel %vm22_vm0, %v909_v31, 0.0  ;;  %v908_v45 = vmul.f32 %v812_v33, %v812_v33  ;;  %v329_v1 = vld [vmem:[#allocation2 + $0x70] sm:$0xff] }
 0x168   :  { %v732_v12 = vpop.f32.mrf.mxu1  ;;  %v829_v47 = vld [vmem:[#allocation3 + $0x38] sm:$0xff] }
 0x169   :  { %796 = vst.msk [vmem:[#allocation3 + $0x48] sm:$0xff] %vm22_vm0, %v780_v9  ;;  %v779_v14 = vadd.f32 %v732_v12, %v568_v6  ;;  %v936_v37 = vsel %vm22_vm0, %v908_v45, 0.0  ;;  %v973_v55 = vmul.f32 %v829_v47, %v829_v47  ;;  %v845_v2 = vmul.f32 %v829_v47, %v813_v22  ;;  %v574_v12 = vld [vmem:[#allocation3 + $0x70] sm:$0xff] }
 0x16a   :  { %v1548_v15 = vpop.f32.mrf.mxu0  ;;  %989 = vadd.xlane.f32.xlu0 %v988_v16  ;;  %v828_v48 = vld [vmem:[#allocation3 + $0x30] sm:$0xff] }
 0x16b   :  { %795 = vst.msk [vmem:[#allocation3 + $0x40] sm:$0xff] %vm22_vm0, %v779_v14  ;;  %v538_v21 = vadd.f32 %v1548_v15, %v326_v13  ;;  %931 = vadd.xlane.f32.xlu1 %v930_v17  ;;  %v844_v56 = vmul.f32 %v828_v48, %v812_v33  ;;  %v1003_v63 = vsel %vm22_vm0, %v973_v55, 0.0  ;;  %v875_v10 = vsel %vm22_vm0, %v845_v2, 0.0 }
 0x16c   :  { %v498_v23 = vpop.f32.mrf.mxu0  ;;  %v2083_v58 = vld [vmem:[#allocation2 + $0x48] sm:$0xff]  ;;  %v972_v13 = vmul.f32 %v828_v48, %v828_v48 }
 0x16d   :  { %555 = vst.msk [vmem:[#allocation2 + $0x58] sm:$0xff] %vm22_vm0, %v538_v21  ;;  %v537_v25 = vadd.f32 %v498_v23, %v325_v18  ;;  %v872_v0 = vsel %vm22_vm0, %v844_v56, 0.0  ;;  %v911_v3 = vmul.f32 %v2083_v58, %v2083_v58 }
 0x16e   :  { %v1576_v26 = vpop.f32.mrf.mxu1  ;;  %998 = vadd.xlane.f32.xlu0 %v997_v27  ;;  %v2091_v5 = vld [vmem:[#allocation2 + $0x40] sm:$0xff]  ;;  %v1000_v20 = vsel %vm22_vm0, %v972_v13, 0.0 }
 0x16f   :  { %554 = vst.msk [vmem:[#allocation2 + $0x50] sm:$0xff] %vm22_vm0, %v537_v25  ;;  %v782_v32 = vadd.f32 %v1576_v26, %v571_v24  ;;  %867 = vadd.xlane.f32.xlu1 %v866_v28  ;;  %v945_v11 = vsel %vm22_vm0, %v911_v3, 0.0  ;;  %v910_v14 = vmul.f32 %v2091_v5, %v2091_v5 }
 0x170   :  { %v742_v34 = vpop.f32.mrf.mxu1  ;;  %v2099_v16 = vld [vmem:[#allocation3 + $0x48] sm:$0xff] }
 0x171   :  { %798 = vst.msk [vmem:[#allocation3 + $0x58] sm:$0xff] %vm22_vm0, %v782_v32  ;;  %v781_v36 = vadd.f32 %v742_v34, %v570_v29  ;;  %v942_v21 = vsel %vm22_vm0, %v910_v14, 0.0  ;;  %v975_v22 = vmul.f32 %v2099_v16, %v2099_v16 }
 0x172   :  { %v1551_v40 = vpop.f32.mrf.mxu0  ;;  %870 = vadd.xlane.f32.xlu0 %v869_v41  ;;  %v830_v24 = vld [vmem:[#allocation3 + $0x40] sm:$0xff] }
 0x173   :  { %797 = vst.msk [vmem:[#allocation3 + $0x50] sm:$0xff] %vm22_vm0, %v781_v36  ;;  %v540_v46 = vadd.f32 %v1551_v40, %v328_v35  ;;  %940 = vadd.xlane.f32.xlu1 %v939_v42  ;;  %v1009_v26 = vsel %vm22_vm0, %v975_v22, 0.0  ;;  %v974_v28 = vmul.f32 %v830_v24, %v830_v24 }
 0x174   :  { %v508_v49 = vpop.f32.mrf.mxu0  ;;  %v2101_v17 = vld [vmem:[#allocation2 + $0x58] sm:$0xff] }
 0x175   :  { %557 = vst.msk [vmem:[#allocation2 + $0x68] sm:$0xff] %vm22_vm0, %v540_v46  ;;  %v539_v51 = vadd.f32 %v508_v49, %v327_v43  ;;  %v913_v23 = vmul.f32 %v2101_v17, %v2101_v17  ;;  %v1006_v32 = vsel %vm22_vm0, %v974_v28, 0.0 }
 0x176   :  { %v1579_v52 = vpop.f32.mrf.mxu1  ;;  %995 = vadd.xlane.f32.xlu0 %v994_v53  ;;  %v816_v25 = vld [vmem:[#allocation2 + $0x50] sm:$0xff] }
 0x177   :  { %556 = vst.msk [vmem:[#allocation2 + $0x60] sm:$0xff] %vm22_vm0, %v539_v51  ;;  %v784_v57 = vadd.f32 %v1579_v52, %v573_v50  ;;  %937 = vadd.xlane.f32.xlu1 %v936_v37  ;;  %v951_v27 = vsel %vm22_vm0, %v913_v23, 0.0  ;;  %v912_v29 = vmul.f32 %v816_v25, %v816_v25 }
 0x178   :  { %v752_v59 = vpop.f32.mrf.mxu1  ;;  %v833_v30 = vld [vmem:[#allocation3 + $0x58] sm:$0xff] }
 0x179   :  { %800 = vst.msk [vmem:[#allocation3 + $0x68] sm:$0xff] %vm22_vm0, %v784_v57  ;;  %v783_v61 = vadd.f32 %v752_v59, %v572_v54  ;;  %v948_v33 = vsel %vm22_vm0, %v912_v29, 0.0  ;;  %v977_v34 = vmul.f32 %v833_v30, %v833_v30 }
 0x17a   :  { %v1554_v62 = vpop.f32.mrf.mxu0  ;;  %1004 = vadd.xlane.f32.xlu0 %v1003_v63  ;;  %v832_v36 = vld [vmem:[#allocation3 + $0x50] sm:$0xff] }
 0x17b   :  { %799 = vst.msk [vmem:[#allocation3 + $0x60] sm:$0xff] %vm22_vm0, %v783_v61  ;;  %v542_v4 = vadd.f32 %v1554_v62, %v330_v60  ;;  %873 = vadd.xlane.f32.xlu1 %v872_v0  ;;  %v1015_v41 = vsel %vm22_vm0, %v977_v34, 0.0  ;;  %v976_v43 = vmul.f32 %v832_v36, %v832_v36  ;;  %v846_v61 = vmul.f32 %v830_v24, %v2091_v5 }
 0x17c   :  { %v518_v6 = vpop.f32.mrf.mxu0  ;;  %v819_v31 = vld [vmem:[#allocation2 + $0x68] sm:$0xff]  ;;  %v848_v2 = vmul.f32 %v832_v36, %v816_v25 }
 0x17d   :  { %559 = vst.msk [vmem:[#allocation2 + $0x78] sm:$0xff] %vm22_vm0, %v542_v4  ;;  %v541_v8 = vadd.f32 %v518_v6, %v329_v1  ;;  %v915_v35 = vmul.f32 %v819_v31, %v819_v31  ;;  %v1012_v47 = vsel %vm22_vm0, %v976_v43, 0.0  ;;  %v878_v0 = vsel %vm22_vm0, %v846_v61, 0.0 }
 0x17e   :  { %v1582_v9 = vpop.f32.mrf.mxu1  ;;  %876 = vadd.xlane.f32.xlu0 %v875_v10  ;;  %v818_v40 = vld [vmem:[#allocation2 + $0x60] sm:$0xff]  ;;  %v884_v4 = vsel %vm22_vm0, %v848_v2, 0.0  ;;  %v847_v6 = vmul.f32 %v2099_v16, %v2083_v58 }
 0x17f   :  { %558 = vst.msk [vmem:[#allocation2 + $0x70] sm:$0xff] %vm22_vm0, %v541_v8  ;;  %v786_v15 = vadd.f32 %v1582_v9, %v575_v7  ;;  %946 = vadd.xlane.f32.xlu1 %v945_v11  ;;  %v957_v42 = vsel %vm22_vm0, %v915_v35, 0.0  ;;  %v914_v44 = vmul.f32 %v818_v40, %v818_v40  ;;  %v849_v9 = vmul.f32 %v833_v30, %v2101_v17 }
 0x180   :  { %v762_v18 = vpop.f32.mrf.mxu1  ;;  %v835_v45 = vld [vmem:[#allocation3 + $0x68] sm:$0xff]  ;;  %v881_v5 = vsel %vm22_vm0, %v847_v6, 0.0 }
 0x181   :  { %802 = vst.msk [vmem:[#allocation3 + $0x78] sm:$0xff] %vm22_vm0, %v786_v15  ;;  %v785_v19 = vadd.f32 %v762_v18, %v574_v12  ;;  %v954_v48 = vsel %vm22_vm0, %v914_v44, 0.0  ;;  %v979_v49 = vmul.f32 %v835_v45, %v835_v45  ;;  %v887_v11 = vsel %vm22_vm0, %v849_v9, 0.0 }
 0x182   :  { %1001 = vadd.xlane.f32.xlu0 %v1000_v20  ;;  %v834_v51 = vld [vmem:[#allocation3 + $0x60] sm:$0xff]  ;;  %v851_v13 = vmul.f32 %v835_v45, %v819_v31 }
 0x183   :  { %801 = vst.msk [vmem:[#allocation3 + $0x70] sm:$0xff] %vm22_vm0, %v785_v19  ;;  %943 = vadd.xlane.f32.xlu1 %v942_v21  ;;  %v1021_v53 = vsel %vm22_vm0, %v979_v49, 0.0  ;;  %v978_v54 = vmul.f32 %v834_v51, %v834_v51  ;;  %v850_v7 = vmul.f32 %v834_v51, %v818_v40 }
 0x184   :  { %v821_v46 = vld [vmem:[#allocation2 + $0x78] sm:$0xff]  ;;  %v893_v58 = vsel %vm22_vm0, %v851_v13, 0.0 }
 0x185   :  { %v917_v50 = vmul.f32 %v821_v46, %v821_v46  ;;  %v1018_v57 = vsel %vm22_vm0, %v978_v54, 0.0  ;;  %v890_v8 = vsel %vm22_vm0, %v850_v7, 0.0 }
 0x186   :  { %1010 = vadd.xlane.f32.xlu0 %v1009_v26  ;;  %v820_v52 = vld [vmem:[#allocation2 + $0x70] sm:$0xff] }
 0x187   :  { %952 = vadd.xlane.f32.xlu1 %v951_v27  ;;  %v963_v37 = vsel %vm22_vm0, %v917_v50, 0.0  ;;  %v916_v55 = vmul.f32 %v820_v52, %v820_v52 }
 0x188   :  { %v837_v56 = vld [vmem:[#allocation3 + $0x78] sm:$0xff] }
 0x189   :  { %v960_v59 = vsel %vm22_vm0, %v916_v55, 0.0  ;;  %v981_v60 = vmul.f32 %v837_v56, %v837_v56  ;;  %v853_v14 = vmul.f32 %v837_v56, %v821_v46 }
 0x18a   :  { %1007 = vadd.xlane.f32.xlu0 %v1006_v32  ;;  %v836_v62 = vld [vmem:[#allocation3 + $0x70] sm:$0xff] }
 0x18b   :  { %949 = vadd.xlane.f32.xlu1 %v948_v33  ;;  %v1027_v63 = vsel %vm22_vm0, %v981_v60, 0.0  ;;  %v980_v1 = vmul.f32 %v836_v62, %v836_v62  ;;  %v852_v10 = vmul.f32 %v836_v62, %v820_v52  ;;  %v899_v15 = vsel %vm22_vm0, %v853_v14, 0.0 }
 0x18d   :  { %v1024_v3 = vsel %vm22_vm0, %v980_v1, 0.0  ;;  %v896_v12 = vsel %vm22_vm0, %v852_v10, 0.0  ;;  %vm1311_vm0 = vcmask 130112  }
 0x18e   :  { %1016 = vadd.xlane.f32.xlu0 %v1015_v41 }
 0x18f   :  { %958 = vadd.xlane.f32.xlu1 %v957_v42 }
 0x192   :  { %1013 = vadd.xlane.f32.xlu0 %v1012_v47 }
 0x193   :  { %955 = vadd.xlane.f32.xlu1 %v954_v48 }
 0x196   :  { %1022 = vadd.xlane.f32.xlu0 %v1021_v53 }
 0x197   :  { %964 = vadd.xlane.f32.xlu1 %v963_v37 }
 0x19a   :  { %1019 = vadd.xlane.f32.xlu0 %v1018_v57 }
 0x19b   :  { %961 = vadd.xlane.f32.xlu1 %v960_v59 }
 0x19e   :  { %1028 = vadd.xlane.f32.xlu0 %v1027_v63 }
 0x19f   :  { %879 = vadd.xlane.f32.xlu1 %v878_v0 }
 0x1a2   :  { %1025 = vadd.xlane.f32.xlu0 %v1024_v3 }
 0x1a3   :  { %885 = vadd.xlane.f32.xlu1 %v884_v4 }
 0x1a6   :  { %882 = vadd.xlane.f32.xlu0 %v881_v5 }
 0x1a7   :  { %891 = vadd.xlane.f32.xlu1 %v890_v8 }
 0x1aa   :  { %888 = vadd.xlane.f32.xlu0 %v887_v11 }
 0x1ab   :  { %897 = vadd.xlane.f32.xlu1 %v896_v12 }
 0x1ae   :  { %894 = vadd.xlane.f32.xlu0 %v893_v58 }
 0x1b2   :  { %900 = vadd.xlane.f32.xlu0 %v899_v15 }
 0x1db   :  { %v987_v16 = vpop.xlane.xlu0 %986 }
 0x1dc   :  { %v923_v18 = vpop.xlane.xlu1 %922  ;;  %v1063_v19 = vmax.f32 %v987_v16, 1e-12 }
 0x1dd   :  { %v1031_v17 = vmax.f32 %v923_v18, 1e-12 }
 0x1df   :  { %1588 = vrsqrt.f32 %v1031_v17  ;;  %v859_v21 = vpop.xlane.xlu0 %858 }
 0x1e0   :  { %v984_v20 = vpop.xlane.xlu1 %983  ;;  %1590 = vrsqrt.f32 %v1063_v19  ;;  %v1095_v29 = vmul.f32 100.0, %v859_v21 }
 0x1e1   :  { %v1062_v24 = vmax.f32 %v984_v20, 1e-12 }
 0x1e3   :  { %v920_v22 = vpop.xlane.xlu0 %919 }
 0x1e4   :  { %v856_v23 = vpop.xlane.xlu1 %855  ;;  %v1030_v25 = vmax.f32 %v920_v22, 1e-12 }
 0x1e5   :  { %v1094_v44 = vmul.f32 100.0, %v856_v23 }
 0x1e6   :  { %1592 = vrsqrt.f32 %v1030_v25 }
 0x1e7   :  { %v929_v26 = vpop.xlane.xlu0 %928  ;;  %1594 = vrsqrt.f32 %v1062_v24 }
 0x1e8   :  { %v865_v27 = vpop.xlane.xlu1 %864  ;;  %v1033_v28 = vmax.f32 %v929_v26, 1e-12 }
 0x1e9   :  { %v1097_v57 = vmul.f32 100.0, %v865_v27 }
 0x1ea   :  { %1596 = vrsqrt.f32 %v1033_v28 }
 0x1eb   :  { %v993_v30 = vpop.xlane.xlu0 %992 }
 0x1ec   :  { %v862_v31 = vpop.xlane.xlu1 %861  ;;  %v1589_v32 = vpop.eup %1588  ;;  %v1065_v33 = vmax.f32 %v993_v30, 1e-12 }
 0x1ed   :  { %v1111_v34 = vmul.f32 %v1589_v32, %v1095_v29  ;;  %v1591_v35 = vpop.eup %1590  ;;  %v1096_v9 = vmul.f32 100.0, %v862_v31 }
 0x1ee   :  { %1598 = vrsqrt.f32 %v1065_v33 }
 0x1ef   :  { %v2137_v36 = vmul.f32 %v1591_v35, %v1111_v34  ;;  %v926_v40 = vpop.xlane.xlu0 %925 }
 0x1f0   :  { %v935_v41 = vpop.xlane.xlu1 %934  ;;  %v1032_v42 = vmax.f32 %v926_v40, 1e-12 }
 0x1f1   :  { %v1159_v43 = vand.u32 2147483647, %v2137_v36  ;;  %v1035_v59 = vmax.f32 %v935_v41, 1e-12 }
 0x1f2   :  { %1600 = vrsqrt.f32 %v1032_v42 }
 0x1f3   :  { %v1593_v45 = vpop.eup %1592  ;;  %v1175_v46 = vsub.f32 0.0, %v1159_v43  ;;  %v990_v47 = vpop.xlane.xlu0 %989 }
 0x1f4   :  { %v932_v48 = vpop.xlane.xlu1 %931  ;;  %v1110_v49 = vmul.f32 %v1593_v45, %v1094_v44  ;;  %v1064_v50 = vmax.f32 %v990_v47, 1e-12  ;;  %v1595_v51 = vpop.eup %1594 }
 0x1f5   :  { %v1192_v52 = vmul.f32 1.442695, %v1175_v46  ;;  %v1034_v10 = vmax.f32 %v932_v48, 1e-12 }
 0x1f6   :  { %v2140_v53 = vmul.f32 %v1595_v51, %v1110_v49  ;;  %1602 = vrsqrt.f32 %v1064_v50 }
 0x1f7   :  { %v1597_v37 = vpop.eup %1596  ;;  %1604 = vpow2.f32 %v1192_v52  ;;  %v999_v54 = vpop.xlane.xlu0 %998 }
 0x1f8   :  { %v2142_v55 = vpop.xlane.xlu1 %867  ;;  %v1158_v56 = vand.u32 2147483647, %v2140_v53  ;;  %v1113_v61 = vmul.f32 %v1597_v37, %v1097_v57  ;;  %v1067_v3 = vmax.f32 %v999_v54, 1e-12  ;;  %1606 = vrsqrt.f32 %v1035_v59 }
 0x1f9   :  { %v1098_v47 = vmul.f32 100.0, %v2142_v55  ;;  %v2162_v37 = vshrl.u32 %v121_v38, 7  ;;  %v1306_v54 = vadd.s32 4294967288, %v1939_v39 }
 0x1fa   :  { %v1174_v60 = vsub.f32 0.0, %v1158_v56 }
 0x1fb   :  { %v1599_v62 = vpop.eup %1598  ;;  %v871_v63 = vpop.xlane.xlu0 %870  ;;  %v1309_v38 = vsub.s32 %v1306_v54, %v2162_v37 }
 0x1fc   :  { %v941_v0 = vpop.xlane.xlu1 %940  ;;  %v1190_v1 = vmul.f32 1.442695, %v1174_v60  ;;  %v2145_v2 = vmul.f32 %v1599_v62, %v1113_v61  ;;  %v1099_v32 = vmul.f32 100.0, %v871_v63 }
 0x1fd   :  { %v1037_v13 = vmax.f32 %v941_v0, 1e-12 }
 0x1fe   :  { %1608 = vpow2.f32 %v1190_v1  ;;  %v1161_v4 = vand.u32 2147483647, %v2145_v2 }
 0x1ff   :  { %v1601_v6 = vpop.eup %1600  ;;  %v996_v7 = vpop.xlane.xlu0 %995  ;;  %1610 = vrsqrt.f32 %v1067_v3 }
 0x200   :  { %v938_v5 = vpop.xlane.xlu1 %937  ;;  %v1177_v8 = vsub.f32 0.0, %v1161_v4  ;;  %v1112_v12 = vmul.f32 %v1601_v6, %v1096_v9  ;;  %v1066_v14 = vmax.f32 %v996_v7, 1e-12  ;;  %v1143_v6 = vmin.f32 %v2137_v36, 0.0 }
 0x201   :  { %v1036_v22 = vmax.f32 %v938_v5, 1e-12  ;;  %v1304_v7 = vsub.s32 %v1939_v39, %v2162_v37 }
 0x202   :  { %v1196_v11 = vmul.f32 1.442695, %v1177_v8  ;;  %v1142_v8 = vmin.f32 %v2140_v53, 0.0 }
 0x203   :  { %v1603_v58 = vpop.eup %1602  ;;  %v1005_v15 = vpop.xlane.xlu0 %1004 }
 0x204   :  { %v874_v16 = vpop.xlane.xlu1 %873  ;;  %v1605_v18 = vpop.eup %1604  ;;  %1612 = vpow2.f32 %v1196_v11  ;;  %v2148_v17 = vmul.f32 %v1603_v58, %v1112_v12  ;;  %v1069_v21 = vmax.f32 %v1005_v15, 1e-12 }
 0x205   :  { %v1223_v19 = vadd.f32 1.0, %v1605_v18  ;;  %1614 = vrsqrt.f32 %v1034_v10  ;;  %v1607_v26 = vpop.eup %1606  ;;  %v1100_v5 = vmul.f32 100.0, %v874_v16 }
 0x206   :  { %v1160_v20 = vand.u32 2147483647, %v2148_v17  ;;  %1616 = vrsqrt.f32 %v1037_v13  ;;  %v1115_v35 = vmul.f32 %v1607_v26, %v1099_v32 }
 0x207   :  { %1618 = vrsqrt.f32 %v1066_v14  ;;  %v877_v23 = vpop.xlane.xlu0 %876 }
 0x208   :  { %v2151_v24 = vpop.xlane.xlu1 %946  ;;  %1620 = vlog2.f32 %v1223_v19  ;;  %v1176_v25 = vsub.f32 0.0, %v1160_v20  ;;  %v1101_v57 = vmul.f32 100.0, %v877_v23 }
 0x209   :  { %1622 = vrsqrt.f32 %v1069_v21  ;;  %v1039_v14 = vmax.f32 %v2151_v24, 1e-12 }
 0x20a   :  { %v1194_v27 = vmul.f32 1.442695, %v1176_v25  ;;  %1624 = vrsqrt.f32 %v1036_v22 }
 0x20b   :  { %v1609_v28 = vpop.eup %1608  ;;  %v1002_v29 = vpop.xlane.xlu0 %1001 }
 0x20c   :  { %v944_v30 = vpop.xlane.xlu1 %943  ;;  %v1222_v31 = vadd.f32 1.0, %v1609_v28  ;;  %1626 = vpow2.f32 %v1194_v27  ;;  %v1068_v33 = vmax.f32 %v1002_v29, 1e-12  ;;  %v1611_v34 = vpop.eup %1610 }
 0x20d   :  { %v2157_v42 = vmul.f32 %v1611_v34, %v1115_v35  ;;  %v1038_v61 = vmax.f32 %v944_v30, 1e-12 }
 0x20e   :  { %1628 = vlog2.f32 %v1222_v31 }
 0x20f   :  { %1630 = vrsqrt.f32 %v1068_v33  ;;  %v2153_v40 = vpop.xlane.xlu0 %1010  ;;  %v1163_v51 = vand.u32 2147483647, %v2157_v42 }
 0x210   :  { %v2155_v41 = vpop.xlane.xlu1 %952  ;;  %v1071_v25 = vmax.f32 %v2153_v40, 1e-12 }
 0x211   :  { %v1613_v43 = vpop.eup %1612  ;;  %v1179_v1 = vsub.f32 0.0, %v1163_v51  ;;  %v1041_v33 = vmax.f32 %v2155_v41, 1e-12  ;;  %v1320_v51 = vadd.s32 4294967272, %v1939_v39 }
 0x212   :  { %v1615_v44 = vpop.eup %1614  ;;  %v1225_v46 = vadd.f32 1.0, %v1613_v43 }
 0x213   :  { %v1617_v45 = vpop.eup %1616  ;;  %v1008_v48 = vpop.xlane.xlu0 %1007  ;;  %v1114_v56 = vmul.f32 %v1615_v44, %v1098_v47  ;;  %v1200_v16 = vmul.f32 1.442695, %v1179_v1 }
 0x214   :  { %v950_v49 = vpop.xlane.xlu1 %949  ;;  %v1619_v50 = vpop.eup %1618  ;;  %1632 = vlog2.f32 %v1225_v46  ;;  %v1117_v3 = vmul.f32 %v1617_v45, %v1101_v57  ;;  %v1070_v11 = vmax.f32 %v1008_v48, 1e-12  ;;  %v1313_v48 = vadd.s32 4294967280, %v1939_v39 }
 0x215   :  { %v1621_v52 = vpop.eup %1620  ;;  %v2165_v60 = vmul.f32 %v1619_v50, %v1114_v56  ;;  %1634 = vrsqrt.f32 %v1038_v61  ;;  %v1040_v53 = vmax.f32 %v950_v49, 1e-12 }
 0x216   :  { %v1623_v59 = vpop.eup %1622  ;;  %v1241_v0 = vmul.f32 0.6931472, %v1621_v52 }
 0x217   :  { %v2167_v62 = vpop.xlane.xlu0 %1016  ;;  %v1625_v63 = vpop.eup %1624  ;;  %v2176_v10 = vmul.f32 %v1623_v59, %v1117_v3  ;;  %v1162_v13 = vand.u32 2147483647, %v2165_v60 }
 0x218   :  { %v2169_v55 = vpop.xlane.xlu1 %958  ;;  %v1116_v58 = vmul.f32 %v1625_v63, %v1100_v5  ;;  %v1271_v19 = vsub.f32 %v1143_v6, %v1241_v0  ;;  %v1073_v46 = vmax.f32 %v2167_v62, 1e-12  ;;  %v1145_v63 = vmin.f32 %v2145_v2, 0.0 }
 0x219   :  { %v1627_v4 = vpop.eup %1626  ;;  %v1165_v23 = vand.u32 2147483647, %v2176_v10  ;;  %v1178_v26 = vsub.f32 0.0, %v1162_v13  ;;  %v1043_v41 = vmax.f32 %v2169_v55, 1e-12  ;;  %v1316_v0 = vsub.s32 %v1313_v48, %v2162_v37 }
 0x21a   :  { %v1224_v9 = vadd.f32 1.0, %v1627_v4  ;;  %v1310_v29 = vrot.slane %v1271_v19, %v1309_v38  ;;  %v1144_v55 = vmin.f32 %v2148_v17, 0.0  ;;  %v1323_v6 = vsub.s32 %v1320_v51, %v2162_v37 }
 0x21b   :  { %v1629_v12 = vpop.eup %1628  ;;  %v1014_v15 = vpop.xlane.xlu0 %1013  ;;  %v1181_v35 = vsub.f32 0.0, %v1165_v23  ;;  %v1198_v40 = vmul.f32 1.442695, %v1178_v26 }
 0x21c   :  { %v956_v18 = vpop.xlane.xlu1 %955  ;;  %v1631_v36 = vpop.eup %1630  ;;  %v1239_v20 = vmul.f32 0.6931472, %v1629_v12  ;;  %1636 = vlog2.f32 %v1224_v9  ;;  %v1072_v24 = vmax.f32 %v1014_v15, 1e-12 }
 0x21d   :  { %v2180_v21 = vmul.f32 %v1631_v36, %v1116_v58  ;;  %1638 = vrsqrt.f32 %v1070_v11  ;;  %v1042_v31 = vmax.f32 %v956_v18, 1e-12  ;;  %v1204_v50 = vmul.f32 1.442695, %v1181_v35 }
 0x21e   :  { %v1270_v22 = vsub.f32 %v1142_v8, %v1239_v20  ;;  %1640 = vrsqrt.f32 %v1039_v14 }
 0x21f   :  { %v2184_v27 = vpop.xlane.xlu0 %1022  ;;  %1642 = vpow2.f32 %v1200_v16  ;;  %v1164_v32 = vand.u32 2147483647, %v2180_v21 }
 0x220   :  { %v2186_v28 = vpop.xlane.xlu1 %964  ;;  %v1305_v30 = vrot.slane %v1270_v22, %v1304_v7  ;;  %1644 = vrsqrt.f32 %v1040_v53  ;;  %v1075_v5 = vmax.f32 %v2184_v27, 1e-12 }
 0x221   :  { %1646 = vrsqrt.f32 %v1071_v25  ;;  %v1633_v45 = vpop.eup %1632  ;;  %v1180_v49 = vsub.f32 0.0, %v1164_v32  ;;  %v1045_v18 = vmax.f32 %v2186_v28, 1e-12 }
 0x222   :  { %v2190_v34 = vsel %vm1311_vm0, %v1310_v29, %v1305_v30  ;;  %1648 = vrsqrt.f32 %v1072_v24  ;;  %v1245_v52 = vmul.f32 0.6931472, %v1633_v45  ;;  %v1635_v59 = vpop.eup %1634 }
 0x223   :  { %v1020_v43 = vpop.xlane.xlu0 %1019  ;;  %1650 = vrsqrt.f32 %v1042_v31  ;;  %v1202_v1 = vmul.f32 1.442695, %v1180_v49 }
 0x224   :  { %v962_v44 = vpop.xlane.xlu1 %961  ;;  %v1074_v47 = vmax.f32 %v1020_v43, 1e-12  ;;  %1652 = vrsqrt.f32 %v1041_v33  ;;  %v1273_v7 = vsub.f32 %v1145_v63, %v1245_v52 }
 0x225   :  { %v1044_v54 = vmax.f32 %v962_v44, 1e-12 }
 0x226   :  { %1654 = vrsqrt.f32 %v1074_v47  ;;  %v1324_v20 = vrot.slane %v1273_v7, %v1323_v6 }
 0x227   :  { %1656 = vpow2.f32 %v1198_v40  ;;  %v1029_v56 = vpop.xlane.xlu0 %1028 }
 0x228   :  { %v880_v57 = vpop.xlane.xlu1 %879  ;;  %1658 = vrsqrt.f32 %v1073_v46  ;;  %v1077_v16 = vmax.f32 %v1029_v56, 1e-12 }
 0x229   :  { %v1102_v61 = vmul.f32 100.0, %v880_v57  ;;  %v1637_v62 = vpop.eup %1636  ;;  %1660 = vrsqrt.f32 %v1043_v41 }
 0x22a   :  { %v1243_v3 = vmul.f32 0.6931472, %v1637_v62  ;;  %1662 = vpow2.f32 %v1204_v50  ;;  %v1639_v38 = vpop.eup %1638 }
 0x22b   :  { %v1118_v4 = vmul.f32 %v1635_v59, %v1102_v61  ;;  %1664 = vrsqrt.f32 %v1044_v54  ;;  %v1026_v8 = vpop.xlane.xlu0 %1025  ;;  %v1641_v11 = vpop.eup %1640 }
 0x22c   :  { %v886_v9 = vpop.xlane.xlu1 %885  ;;  %v1272_v2 = vsub.f32 %v1144_v55, %v1243_v3  ;;  %v1076_v13 = vmax.f32 %v1026_v8, 1e-12  ;;  %v2203_v14 = vpop.eup %1642  ;;  %1666 = vpow2.f32 %v1202_v1 }
 0x22d   :  { %v2201_v12 = vmul.f32 %v1639_v38, %v1118_v4  ;;  %v1104_v58 = vmul.f32 100.0, %v886_v9  ;;  %v1645_v17 = vpop.eup %1644 }
 0x22e   :  { %v1317_v15 = vrot.slane %v1272_v2, %v1316_v0  ;;  %1668 = vrsqrt.f32 %v1076_v13  ;;  %v1647_v19 = vpop.eup %1646  ;;  %v1227_v13 = vadd.f32 1.0, %v2203_v14 }
 0x22f   :  { %v1166_v36 = vand.u32 2147483647, %v2201_v12  ;;  %1670 = vrsqrt.f32 %v1075_v5  ;;  %v1120_v53 = vmul.f32 %v1645_v17, %v1104_v58  ;;  %v883_v22 = vpop.xlane.xlu0 %882  ;;  %v1649_v25 = vpop.eup %1648 }
 0x230   :  { %v892_v23 = vpop.xlane.xlu1 %891  ;;  %v1319_v26 = vsel %vm1318_vm1, %v1317_v15, %v2190_v34  ;;  %v1103_v27 = vmul.f32 100.0, %v883_v22  ;;  %v1651_v30 = vpop.eup %1650  ;;  %1672 = vrsqrt.f32 %v1045_v18 }
 0x231   :  { %v1182_v24 = vsub.f32 0.0, %v1166_v36  ;;  %v1106_v29 = vmul.f32 100.0, %v892_v23  ;;  %v2210_v28 = vsel %vm1325_vm6, %v1324_v20, %v1319_v26  ;;  %v2212_v31 = vmul.f32 %v1649_v25, %v1120_v53  ;;  %v1653_v32 = vpop.eup %1652 }
 0x232   :  { %v1119_v35 = vmul.f32 %v1641_v11, %v1103_v27  ;;  %1674 = vrsqrt.f32 %v1077_v16 }
 0x233   :  { %v1206_v33 = vmul.f32 1.442695, %v1182_v24  ;;  %v1122_v40 = vmul.f32 %v1651_v30, %v1106_v29  ;;  %v1655_v43 = vpop.eup %1654  ;;  %v1168_v44 = vand.u32 2147483647, %v2212_v31  ;;  %v889_v45 = vpop.xlane.xlu0 %888 }
 0x234   :  { %v898_v34 = vpop.xlane.xlu1 %897  ;;  %v1657_v46 = vpop.eup %1656  ;;  %v2215_v47 = vmul.f32 %v1647_v19, %v1119_v35  ;;  %v1105_v49 = vmul.f32 100.0, %v889_v45 }
 0x235   :  { %1676 = vpow2.f32 %v1206_v33  ;;  %v2217_v48 = vmul.f32 %v1655_v43, %v1122_v40  ;;  %v1659_v41 = vpop.eup %1658  ;;  %v1184_v50 = vsub.f32 0.0, %v1168_v44  ;;  %v1108_v54 = vmul.f32 100.0, %v898_v34 }
 0x236   :  { %v1661_v51 = vpop.eup %1660  ;;  %v1167_v52 = vand.u32 2147483647, %v2215_v47  ;;  %v1226_v57 = vadd.f32 1.0, %v1657_v46  ;;  %v1121_v62 = vmul.f32 %v1653_v32, %v1105_v49 }
 0x237   :  { %v1663_v56 = vpop.eup %1662  ;;  %v1210_v59 = vmul.f32 1.442695, %v1184_v50  ;;  %v1170_v61 = vand.u32 2147483647, %v2217_v48  ;;  %v895_v63 = vpop.xlane.xlu0 %894 }
 0x238   :  { %v1665_v0 = vpop.eup %1664  ;;  %v1183_v1 = vsub.f32 0.0, %v1167_v52  ;;  %v1107_v55 = vmul.f32 100.0, %v895_v63  ;;  %v2221_v4 = vmul.f32 %v1659_v41, %v1121_v62  ;;  %v1229_v53 = vadd.f32 1.0, %v1663_v56 }
 0x239   :  { %1678 = vpow2.f32 %v1210_v59  ;;  %v1186_v3 = vsub.f32 0.0, %v1170_v61  ;;  %v1667_v38 = vpop.eup %1666  ;;  %v1124_v7 = vmul.f32 %v1665_v0, %v1108_v54  ;;  %v1327_v52 = vadd.s32 4294967264, %v1939_v39 }
 0x23a   :  { %v1208_v6 = vmul.f32 1.442695, %v1183_v1  ;;  %v1123_v5 = vmul.f32 %v1661_v51, %v1107_v55  ;;  %1680 = vlog2.f32 %v1226_v57  ;;  %v1169_v58 = vand.u32 2147483647, %v2221_v4 }
 0x23b   :  { %v1669_v8 = vpop.eup %1668  ;;  %v1214_v9 = vmul.f32 1.442695, %v1186_v3  ;;  %v901_v11 = vpop.xlane.xlu0 %900  ;;  %v1228_v15 = vadd.f32 1.0, %v1667_v38  ;;  %v1334_v59 = vadd.s32 4294967256, %v1939_v39  ;;  %v1146_v61 = vmin.f32 %v2165_v60, 0.0 }
 0x23c   :  { %v1671_v2 = vpop.eup %1670  ;;  %1682 = vpow2.f32 %v1208_v6  ;;  %v2225_v17 = vmul.f32 %v1669_v8, %v1124_v7  ;;  %v1185_v36 = vsub.f32 0.0, %v1169_v58  ;;  %v1109_v20 = vmul.f32 100.0, %v901_v11 }
 0x23d   :  { %1684 = vpow2.f32 %v1214_v9  ;;  %v2227_v18 = vmul.f32 %v1671_v2, %v1123_v5  ;;  %v1673_v16 = vpop.eup %1672  ;;  %v1341_v0 = vadd.s32 4294967248, %v1939_v39  ;;  %v1330_v3 = vsub.s32 %v1327_v52, %v2162_v37 }
 0x23e   :  { %v1172_v19 = vand.u32 2147483647, %v2225_v17  ;;  %1686 = vlog2.f32 %v1227_v13  ;;  %v1212_v14 = vmul.f32 1.442695, %v1185_v36  ;;  %v1125_v26 = vmul.f32 %v1673_v16, %v1109_v20 }
 0x23f   :  { %v1171_v22 = vand.u32 2147483647, %v2227_v18  ;;  %v1675_v23 = vpop.eup %1674  ;;  %1688 = vlog2.f32 %v1228_v15  ;;  %v1147_v5 = vmin.f32 %v2157_v42, 0.0  ;;  %v1348_v8 = vadd.s32 4294967240, %v1939_v39 }
 0x240   :  { %v1188_v25 = vsub.f32 0.0, %v1172_v19  ;;  %1690 = vpow2.f32 %v1212_v14  ;;  %v2231_v32 = vmul.f32 %v1675_v23, %v1125_v26  ;;  %v1337_v60 = vsub.s32 %v1334_v59, %v2162_v37 }
 0x241   :  { %v1187_v27 = vsub.f32 0.0, %v1171_v22  ;;  %1692 = vlog2.f32 %v1229_v53  ;;  %v1148_v11 = vmin.f32 %v2180_v21, 0.0  ;;  %v1355_v2 = vadd.s32 4294967232, %v1939_v39 }
 0x242   :  { %v1677_v24 = vpop.eup %1676  ;;  %v1218_v30 = vmul.f32 1.442695, %v1188_v25  ;;  %v1173_v35 = vand.u32 2147483647, %v2231_v32  ;;  %v1344_v15 = vsub.s32 %v1341_v0, %v2162_v37  ;;  %v1362_v36 = vadd.s32 4294967224, %v1939_v39 }
 0x243   :  { %v1230_v29 = vadd.f32 1.0, %v1677_v24  ;;  %v1216_v33 = vmul.f32 1.442695, %v1187_v27  ;;  %v1351_v53 = vsub.s32 %v1348_v8, %v2162_v37  ;;  %v1358_v21 = vsub.s32 %v1355_v2, %v2162_v37 }
 0x244   :  { %v1189_v43 = vsub.f32 0.0, %v1173_v35  ;;  %v1150_v14 = vmin.f32 %v2201_v12, 0.0  ;;  %v1149_v26 = vmin.f32 %v2176_v10, 0.0  ;;  %v1369_v24 = vadd.s32 4294967216, %v1939_v39 }
 0x245   :  { %1694 = vlog2.f32 %v1230_v29  ;;  %v1365_v27 = vsub.s32 %v1362_v36, %v2162_v37  ;;  %v1152_v52 = vmin.f32 %v2212_v31, 0.0 }
 0x246   :  { %1696 = vpow2.f32 %v1218_v30  ;;  %v1679_v40 = vpop.eup %1678  ;;  %v1220_v34 = vmul.f32 1.442695, %v1189_v43 }
 0x247   :  { %1698 = vpow2.f32 %v1216_v33  ;;  %v1232_v44 = vadd.f32 1.0, %v1679_v40  ;;  %v1681_v45 = vpop.eup %1680 }
 0x248   :  { %1700 = vpow2.f32 %v1220_v34  ;;  %v1247_v54 = vmul.f32 0.6931472, %v1681_v45  ;;  %v1151_v45 = vmin.f32 %v2215_v47, 0.0  ;;  %v1372_v47 = vsub.s32 %v1369_v24, %v2162_v37 }
 0x249   :  { %v1683_v46 = vpop.eup %1682  ;;  %1702 = vlog2.f32 %v1232_v44 }
 0x24a   :  { %v1685_v49 = vpop.eup %1684  ;;  %v1231_v41 = vadd.f32 1.0, %v1683_v46  ;;  %v1274_v38 = vsub.f32 %v1146_v61, %v1247_v54  ;;  %v1383_v46 = vadd.s32 4294967200, %v1939_v39 }
 0x24b   :  { %v1234_v50 = vadd.f32 1.0, %v1685_v49  ;;  %v1687_v51 = vpop.eup %1686 }
 0x24c   :  { %1704 = vlog2.f32 %v1231_v41  ;;  %v1689_v56 = vpop.eup %1688  ;;  %v1249_v63 = vmul.f32 0.6931472, %v1687_v51  ;;  %v1331_v20 = vrot.slane %v1274_v38, %v1330_v3  ;;  %v1154_v38 = vmin.f32 %v2217_v48, 0.0 }
 0x24d   :  { %v1691_v57 = vpop.eup %1690  ;;  %1706 = vlog2.f32 %v1234_v50  ;;  %v1251_v6 = vmul.f32 0.6931472, %v1689_v56  ;;  %v1376_v50 = vadd.s32 4294967208, %v1939_v39  ;;  %v1404_v48 = vadd.s32 4294967176, %v1939_v39 }
 0x24e   :  { %v1693_v62 = vpop.eup %1692  ;;  %v1233_v1 = vadd.f32 1.0, %v1691_v57  ;;  %v1275_v58 = vsub.f32 %v1147_v5, %v1249_v63  ;;  %v1333_v40 = vsel %vm1332_vm7, %v1331_v20, %v2210_v28  ;;  %v1390_v57 = vadd.s32 4294967192, %v1939_v39 }
 0x24f   :  { %v1276_v16 = vsub.f32 %v1148_v11, %v1251_v6  ;;  %v1253_v22 = vmul.f32 0.6931472, %v1693_v62  ;;  %v1386_v62 = vsub.s32 %v1383_v46, %v2162_v37  ;;  %v1397_v6 = vadd.s32 4294967184, %v1939_v39 }
 0x250   :  { %1708 = vlog2.f32 %v1233_v1  ;;  %v1338_v33 = vrot.slane %v1275_v58, %v1337_v60  ;;  %v1379_v1 = vsub.s32 %v1376_v50, %v2162_v37 }
 0x251   :  { %v1345_v35 = vrot.slane %v1276_v16, %v1344_v15  ;;  %v1277_v44 = vsub.f32 %v1149_v26, %v1253_v22  ;;  %v1155_v15 = vmin.f32 %v2227_v18, 0.0  ;;  %v1400_v16 = vsub.s32 %v1397_v6, %v2162_v37 }
 0x252   :  { %v1695_v55 = vpop.eup %1694  ;;  %v1340_v49 = vsel %vm1339_vm8, %v1338_v33, %v1333_v40  ;;  %v1407_v18 = vsub.s32 %v1404_v48, %v2162_v37 }
 0x253   :  { %v1697_v7 = vpop.eup %1696  ;;  %v1255_v42 = vmul.f32 0.6931472, %v1695_v55  ;;  %v1347_v51 = vsel %vm1346_vm9, %v1345_v35, %v1340_v49  ;;  %v1352_v54 = vrot.slane %v1277_v44, %v1351_v53  ;;  %v1153_v55 = vmin.f32 %v2221_v4, 0.0 }
 0x254   :  { %v1699_v9 = vpop.eup %1698  ;;  %v1236_v13 = vadd.f32 1.0, %v1697_v7 }
 0x255   :  { %v1235_v19 = vadd.f32 1.0, %v1699_v9  ;;  %v1701_v23 = vpop.eup %1700  ;;  %v1278_v43 = vsub.f32 %v1150_v14, %v1255_v42  ;;  %v1354_v0 = vsel %vm1353_vm10, %v1352_v54, %v1347_v51  ;;  %v1393_v9 = vsub.s32 %v1390_v57, %v2162_v37 }
 0x256   :  { %1710 = vlog2.f32 %v1236_v13  ;;  %v1703_v25 = vpop.eup %1702  ;;  %v1237_v29 = vadd.f32 1.0, %v1701_v23  ;;  %v1156_v13 = vmin.f32 %v2225_v17, 0.0  ;;  %v1157_v17 = vmin.f32 %v2231_v32, 0.0 }
 0x257   :  { %1712 = vlog2.f32 %v1235_v19  ;;  %v1259_v12 = vmul.f32 0.6931472, %v1703_v25  ;;  %v1359_v28 = vrot.slane %v1278_v43, %v1358_v21 }
 0x258   :  { %1714 = vlog2.f32 %v1237_v29 }
 0x259   :  { %v1705_v30 = vpop.eup %1704  ;;  %v1280_v61 = vsub.f32 %v1152_v52, %v1259_v12  ;;  %v1361_v31 = vsel %vm1360_vm11, %v1359_v28, %v1354_v0 }
 0x25a   :  { %v1257_v34 = vmul.f32 0.6931472, %v1705_v30  ;;  %v1707_v10 = vpop.eup %1706 }
 0x25b   :  { %v1263_v63 = vmul.f32 0.6931472, %v1707_v10  ;;  %v1373_v11 = vrot.slane %v1280_v61, %v1372_v47 }
 0x25c   :  { %v1279_v41 = vsub.f32 %v1151_v45, %v1257_v34 }
 0x25d   :  { %v1709_v59 = vpop.eup %1708  ;;  %v1282_v2 = vsub.f32 %v1154_v38, %v1263_v63 }
 0x25e   :  { %v1366_v56 = vrot.slane %v1279_v41, %v1365_v27  ;;  %v1261_v3 = vmul.f32 0.6931472, %v1709_v59 }
 0x25f   :  { %v1387_v23 = vrot.slane %v1282_v2, %v1386_v62 }
 0x260   :  { %v1368_v5 = vsel %vm1367_vm12, %v1366_v56, %v1361_v31  ;;  %v1281_v8 = vsub.f32 %v1153_v55, %v1261_v3 }
 0x261   :  { %v1375_v20 = vsel %vm1374_vm13, %v1373_v11, %v1368_v5 }
 0x262   :  { %v1380_v58 = vrot.slane %v1281_v8, %v1379_v1 }
 0x263   :  { %v1711_v7 = vpop.eup %1710 }
 0x264   :  { %v1713_v60 = vpop.eup %1712  ;;  %v1267_v4 = vmul.f32 0.6931472, %v1711_v7  ;;  %v1382_v53 = vsel %vm1381_vm14, %v1380_v58, %v1375_v20 }
 0x265   :  { %v1265_v36 = vmul.f32 0.6931472, %v1713_v60  ;;  %v1715_v22 = vpop.eup %1714  ;;  %v1389_v25 = vsel %vm1388_vm15, %v1387_v23, %v1382_v53 }
 0x266   :  { %v1284_v19 = vsub.f32 %v1156_v13, %v1267_v4  ;;  %v1269_v14 = vmul.f32 0.6931472, %v1715_v22 }
 0x267   :  { %v1283_v42 = vsub.f32 %v1155_v15, %v1265_v36 }
 0x268   :  { %v1401_v26 = vrot.slane %v1284_v19, %v1400_v16  ;;  %v1285_v39 = vsub.f32 %v1157_v17, %v1269_v14 }
 0x269   :  { %v1394_v21 = vrot.slane %v1283_v42, %v1393_v9 }
 0x26a   :  { %v1408_v27 = vrot.slane %v1285_v39, %v1407_v18 }
 0x26b   :  { %v1396_v24 = vsel %vm1395_vm2, %v1394_v21, %v1389_v25 }
 0x26c   :  { %v1403_v29 = vsel %vm1402_vm3, %v1401_v26, %v1396_v24 }
 0x26d   :  { %v1410_v30 = vsel %vm1409_vm4, %v1408_v27, %v1403_v29 }
 0x26e   :  { %1412 = vst [vmem:[#allocation4] sm:$0x1] %v1410_v30 }
 0x26f   :  { %1727 = shalt.err (!%p1724_p4)
}
 0x270   :  { %1422 = dma.vmem_to_hbm [thread:$0]  %s1420_s1, 16, %s2283_s4, [#allocation5]  }
 0x271   :  { %1736 = dma.done.wait [#allocation5], 16  }
 0x272   :  { %1737 = vsyncadd [#allocation5], 4294967280 }
 0x273   :  { %1426 = vsyncpa [#allocation5], 1 }

</bundles_post_ra>
